<compile_context>
chip_gen: v7x
topology: tpu7x:2x2x1
jax: 0.10.0
libtpu: 0.0.40
codegen_flags: <defaults>
</compile_context>

<pallas_src>
import functools

import numpy as np
import jax
import jax.numpy as jnp
from jax.experimental import pallas as pl
from jax.experimental.pallas import tpu as pltpu

DTYPE = jnp.float32

# Standard SMPL kinematic tree (parent of joint i; joint 0 is the root).
# Replaces kintree_table from the pickle (id_to_col is the identity).
PARENTS = [-1, 0, 0, 0, 1, 2, 3, 4, 5, 6, 7, 8, 9, 9, 9, 12, 13, 14,
           16, 17, 18, 19, 20, 21]
# Joints grouped by depth in the tree (root = depth 0): the chain composes
# with 8 batched 4x4 matmuls instead of 23 scalar-dispatched ones.
_LEVELS = ((1, 2, 3), (4, 5, 6), (7, 8, 9), (10, 11, 12, 13, 14),
           (15, 16, 17), (18, 19), (20, 21), (22, 23))
N_JOINTS = 24
N_BETAS = 10
N_POSEDIR = (N_JOINTS - 1) * 9           # 207
N_FEAT = N_BETAS + N_POSEDIR             # 217
N_FEAT_PAD = 224                         # clean bf16 sublane multiple


def _round_up(x, m):
    return (x + m - 1) // m * m


def _choose_v_tile(v_pad, max_tile):
    """Largest divisor tile of v_pad (in 128-blocks) <= max_tile; even tile
    counts (>=2) preferred so v7x's two TensorCores get an even split."""
    n128 = v_pad // 128
    best_key, best_tile = None, 128
    for n_tiles in range(1, n128 + 1):
        if n128 % n_tiles:
            continue
        tile = (n128 // n_tiles) * 128
        if tile > max_tile:
            continue
        even = (n_tiles >= 2 and n_tiles % 2 == 0)
        key = (0 if even else 1, n_tiles)     # prefer even count, then fewest tiles
        if best_key is None or key < best_key:
            best_key, best_tile = key, tile
    return best_tile


# --------------------------------------------------------------------------
# Fused Pallas kernel: blendshapes + skinning + joint regression per tile.
# --------------------------------------------------------------------------
def _smpl_kernel(feat_ref, a_ref, dirs_ref, vt_ref, wT_ref, jregT_ref,
                 verts_ref, jpart_ref):
    """One vertex tile of the full SMPL forward.

    feat_ref  : [B, 224]       bf16 concat(betas, lrotmin, zero pad)
    a_ref     : [16*B, 24]     bf16 global joint transforms, component-major
    dirs_ref  : [3, 224, Vt]   bf16 concat(shapedirs, posedirs), channel-major
    vt_ref    : [3, Vt]        f32  v_template, channel-major
    wT_ref    : [24, Vt]       bf16 skinning weights^T
    jregT_ref : [Vt, 24]       bf16 joint_regressor^T (zero rows for padding)
    verts_ref : [3*B, Vt]      f32  output vertices, channel-major flattened
    jpart_ref : [1, 3, B, 24]  f32  output per-tile partial joint sums
    """
    b = feat_ref.shape[0]

    feat = feat_ref[...]                                           # bf16 [B,224]

    # Per-vertex 4x4 transforms, component-major rows:
    # tp[c*B + b, v] = sum_j A[c, b, j] * w[v, j],  c = 4*i + k
    tp = jnp.dot(a_ref[...], wT_ref[...],
                 preferred_element_type=jnp.float32)               # [16*B, Vt]

    # Posed rest vertices, one xyz channel at a time (channel-major planar).
    vposed = []
    for c in range(3):
        bs = jnp.dot(feat, dirs_ref[c],
                     preferred_element_type=jnp.float32)           # [B, Vt]
        vposed.append(vt_ref[c:c + 1, :] + bs)
    x, y, z = vposed

    jregT = jregT_ref[...]                                         # [Vt, 24]
    for i in range(3):  # output xyz rows of the 4x4 transform
        res_i = (tp[(4 * i + 0) * b:(4 * i + 1) * b, :] * x +
                 tp[(4 * i + 1) * b:(4 * i + 2) * b, :] * y +
                 tp[(4 * i + 2) * b:(4 * i + 3) * b, :] * z +
                 tp[(4 * i + 3) * b:(4 * i + 4) * b, :])           # [B, Vt]
        verts_ref[i * b:(i + 1) * b, :] = res_i
        jpart_ref[0, i, :, :] = jnp.dot(res_i, jregT,
                                        preferred_element_type=jnp.float32)


# --------------------------------------------------------------------------
# JAX glue (small sequential / per-joint math)
# --------------------------------------------------------------------------
def rodrigues(r):
    """r: [N, 1, 3] axis-angle -> [N, 3, 3] rotation matrices."""
    # TODO(synk): torch adds N(0, 1e-8) noise before the norm (to avoid /0);
    # we use a deterministic 1e-8 offset instead.
    theta = jnp.sqrt(jnp.sum((r + 1e-8) ** 2, axis=(1, 2), keepdims=True))
    r_hat = r / theta                                      # [N, 1, 3]
    cos = jnp.cos(theta)
    n = r.shape[0]
    z = jnp.zeros((n,), DTYPE)
    m = jnp.stack(
        (z, -r_hat[:, 0, 2], r_hat[:, 0, 1],
         r_hat[:, 0, 2], z, -r_hat[:, 0, 0],
         -r_hat[:, 0, 1], r_hat[:, 0, 0], z), axis=1).reshape(-1, 3, 3)
    i_cube = jnp.eye(3, dtype=DTYPE)[None]
    dot = jnp.matmul(jnp.transpose(r_hat, (0, 2, 1)), r_hat)
    return cos * i_cube + (1.0 - cos) * dot + jnp.sin(theta) * m


def _with_zeros(x):
    """x: [B, 3, 4] -> [B, 4, 4] (append homogeneous row)."""
    bottom = jnp.broadcast_to(
        jnp.array([0.0, 0.0, 0.0, 1.0], DTYPE), (x.shape[0], 1, 4))
    return jnp.concatenate([x, bottom], axis=1)


def kinematic_chain(R_big, J):
    """Vectorized chain: R_big [B,24,3,3], J [B,24,3] -> relative global
    transforms [B,24,4,4].  Composed level-by-level (8 batched matmuls)."""
    bsz = R_big.shape[0]
    par = jnp.array([0] + PARENTS[1:], dtype=jnp.int32)
    t_loc = J - J[:, par]                                      # [B,24,3]
    t_loc = t_loc.at[:, 0].set(J[:, 0])                        # root keeps J0
    local = jnp.concatenate([R_big, t_loc[..., None]], axis=3)  # [B,24,3,4]
    bottom = jnp.broadcast_to(jnp.array([0.0, 0.0, 0.0, 1.0], DTYPE),
                              (bsz, N_JOINTS, 1, 4))
    local = jnp.concatenate([local, bottom], axis=2)            # [B,24,4,4]

    G = local
    for lvl in _LEVELS:
        idx = jnp.array(lvl, dtype=jnp.int32)
        pidx = jnp.array([PARENTS[i] for i in lvl], dtype=jnp.int32)
        G = G.at[:, idx].set(jnp.matmul(G[:, pidx], G[:, idx]))

    j_h = jnp.concatenate([J, jnp.zeros((bsz, N_JOINTS, 1), DTYPE)], axis=2)
    t = jnp.matmul(G, j_h[..., None])[..., 0]                   # [B,24,4]
    return G.at[..., 3].add(-t)                                 # == G - pack(t)


def _kinematic_chain_loop(R_big, J):
    """Loop-based chain mirroring the PyTorch code (reference only)."""
    bsz = R_big.shape[0]
    results = [_with_zeros(
        jnp.concatenate([R_big[:, 0], J[:, 0, :, None]], axis=2))]
    for i in range(1, N_JOINTS):
        p = PARENTS[i]
        local = _with_zeros(jnp.concatenate(
            [R_big[:, i], (J[:, i] - J[:, p])[:, :, None]], axis=2))
        results.append(jnp.matmul(results[p], local))
    stacked = jnp.stack(results, axis=1)
    j_h = jnp.concatenate(
        [J, jnp.zeros((bsz, N_JOINTS, 1), DTYPE)], axis=2)[..., None]
    t = jnp.matmul(stacked, j_h)
    return stacked - jnp.concatenate(
        [jnp.zeros((bsz, N_JOINTS, 4, 3), DTYPE), t], axis=3)


# --------------------------------------------------------------------------
# One-time parameter preparation (layout, padding, constant folding).
# --------------------------------------------------------------------------
def prepare_params(params, *, max_v_tile=3456):
    """Kernel-ready planar/padded parameter layouts + J-regression constants.

    Vertex padding is to a tile multiple where the tile is a divisor of
    round_up(V, 128); padded columns/rows are zero (kernel correctness relies
    on that invariant)."""
    n_verts = params['v_template'].shape[0]
    v_pad = _round_up(n_verts, 128)
    v_tile = _choose_v_tile(v_pad, max_v_tile)
    n_tiles = v_pad // v_tile
    pad = v_pad - n_verts
    feat_pad = N_FEAT_PAD - N_FEAT

    # Channel-major blend directions [3, 224, Vpad] bf16; rows 0..9 = shapedirs,
    # rows 10..216 = posedirs, rows 217..223 = zero padding.  These dominate
    # HBM traffic (f32 accumulation happens in the kernel).
    sdir = jnp.transpose(params['shapedirs'].astype(DTYPE), (1, 2, 0))  # [3,10,V]
    pdir = jnp.transpose(params['posedirs'].astype(DTYPE), (1, 2, 0))   # [3,207,V]
    dirs = jnp.concatenate([sdir, pdir], axis=1)                        # [3,217,V]
    dirs = jnp.pad(dirs, ((0, 0), (0, feat_pad), (0, pad))).astype(jnp.bfloat16)

    vtemp = jnp.pad(params['v_template'].astype(DTYPE).T, ((0, 0), (0, pad)))
    w_t = jnp.pad(params['weights'].astype(DTYPE).T,
                  ((0, 0), (0, pad))).astype(jnp.bfloat16)              # [24,Vpad]
    joint_reg = params.get('joint_regressor', params['J_regressor'])
    jreg_t = jnp.pad(joint_reg.astype(DTYPE).T,
                     ((0, pad), (0, 0))).astype(jnp.bfloat16)           # [Vpad,24]

    # Constants for computing J directly from betas in the wrapper:
    # J[b] = J_regressor @ v_template + betas @ (J_regressor @ shapedirs)
    jreg = params['J_regressor'].astype(DTYPE)                          # [24, V]
    j_template = jnp.dot(jreg, params['v_template'].astype(DTYPE))      # [24, 3]
    j_dirs = jnp.einsum('jv,vck->jkc', jreg,
                        params['shapedirs'].astype(DTYPE))              # [24,10,3]

    prep = {'dirs': dirs, 'v_template_t': vtemp, 'weights_t': w_t,
            'jreg_t': jreg_t, 'j_template': j_template, 'j_dirs': j_dirs}
    meta = {'n_verts': n_verts, 'v_pad': v_pad, 'v_tile': v_tile,
            'n_tiles': n_tiles}
    return prep, meta


# --------------------------------------------------------------------------
# Forward pass (Pallas hot path + JAX glue)
# --------------------------------------------------------------------------
def smpl_forward(prep, betas, pose, trans, *, n_verts, v_tile):
    bsz = betas.shape[0]
    v_pad = prep['dirs'].shape[-1]
    assert v_pad % v_tile == 0
    n_tiles = v_pad // v_tile

    betas = betas.astype(DTYPE)

    # glue: pose -> rotation matrices and pose-blend feature (zero-padded to
    # 224 to match the padded dirs feature axis, pre-cast to bf16).
    R_big = rodrigues(pose.astype(DTYPE).reshape(-1, 1, 3)).reshape(
        bsz, N_JOINTS, 3, 3)
    lrotmin = (R_big[:, 1:] - jnp.eye(3, dtype=DTYPE)).reshape(bsz, N_POSEDIR)
    feat = jnp.concatenate(
        [betas, lrotmin, jnp.zeros((bsz, N_FEAT_PAD - N_FEAT), DTYPE)],
        axis=1).astype(jnp.bfloat16)                                # [B, 224]

    # glue: joints of the shaped rest mesh directly from betas (constants
    # were pre-folded with J_regressor in prepare_params).
    J = prep['j_template'][None] + jnp.einsum('bk,jkc->bjc', betas,
                                              prep['j_dirs'])       # [B, 24, 3]

    # glue: vectorized kinematic chain (8 batched 4x4 matmuls).
    A = kinematic_chain(R_big, J)                                   # [B,24,4,4]
    # Fold the global translation into the translation column (skinning
    # weights sum to 1, so this is exact).
    A = A.at[:, :, :3, 3].add(trans.astype(DTYPE)[:, None, :])
    # Component-major layout: row = 4*i + k (transform component), then batch.
    a_comp = A.transpose(2, 3, 0, 1).reshape(16 * bsz, N_JOINTS).astype(
        jnp.bfloat16)                                               # [16*B, 24]

    # Cost estimate (lets XLA overlap the glue with the mem-bound kernel).
    bytes_const = sum(int(x.size) * x.dtype.itemsize
                      for x in (prep['dirs'], prep['v_template_t'],
                                prep['weights_t'], prep['jreg_t']))
    bytes_io = (bytes_const
                + n_tiles * (int(feat.size) * 2 + int(a_comp.size) * 2)
                + 3 * bsz * v_pad * 4 + n_tiles * 3 * bsz * N_JOINTS * 4)
    flops = (2 * 3 * bsz * N_FEAT_PAD * v_pad       # blendshapes
             + 2 * 16 * bsz * N_JOINTS * v_pad      # skinning T
             + 2 * 3 * bsz * v_pad * N_JOINTS       # joint regression
             + 12 * bsz * v_pad)                    # transform apply
    cost = pl.CostEstimate(flops=int(flops), transcendentals=0,
                           bytes_accessed=int(bytes_io))

    verts_flat, jpart = pl.pallas_call(
        _smpl_kernel,
        out_shape=(
            jax.ShapeDtypeStruct((3 * bsz, v_pad), DTYPE),
            jax.ShapeDtypeStruct((n_tiles, 3, bsz, N_JOINTS), DTYPE),
        ),
        grid_spec=pltpu.PrefetchScalarGridSpec(
            num_scalar_prefetch=0,
            grid=(n_tiles,),
            in_specs=[
                pl.BlockSpec((bsz, N_FEAT_PAD), lambda v: (0, 0)),
                pl.BlockSpec((16 * bsz, N_JOINTS), lambda v: (0, 0)),
                pl.BlockSpec((3, N_FEAT_PAD, v_tile), lambda v: (0, 0, v)),
                pl.BlockSpec((3, v_tile), lambda v: (0, v)),
                pl.BlockSpec((N_JOINTS, v_tile), lambda v: (0, v)),
                pl.BlockSpec((v_tile, N_JOINTS), lambda v: (v, 0)),
            ],
            out_specs=(
                pl.BlockSpec((3 * bsz, v_tile), lambda v: (0, v)),
                pl.BlockSpec((1, 3, bsz, N_JOINTS), lambda v: (v, 0, 0, 0)),
            ),
        ),
        compiler_params=pltpu.CompilerParams(
            dimension_semantics=("parallel",)),
        cost_estimate=cost,
    )(feat, a_comp, prep['dirs'], prep['v_template_t'], prep['weights_t'],
      prep['jreg_t'])

    verts = verts_flat[:, :n_verts].reshape(3, bsz, n_verts).transpose(1, 2, 0)
    joints = jnp.sum(jpart, axis=0).transpose(1, 2, 0)              # [B, 24, 3]
    return verts, joints


# Pure-JAX reference mirroring the PyTorch forward (for validation only).
def smpl_forward_reference(params, betas, pose, trans):
    bsz = betas.shape[0]
    v_shaped = (jnp.tensordot(betas, params['shapedirs'], axes=([1], [2]))
                + params['v_template'][None])
    J = jnp.einsum('jv,bvc->bjc', params['J_regressor'], v_shaped)
    R_big = rodrigues(pose.reshape(-1, 1, 3)).reshape(bsz, N_JOINTS, 3, 3)
    lrotmin = (R_big[:, 1:] - jnp.eye(3, dtype=DTYPE)).reshape(bsz, N_POSEDIR)
    v_posed = v_shaped + jnp.tensordot(lrotmin, params['posedirs'],
                                       axes=([1], [2]))
    A = _kinematic_chain_loop(R_big, J)
    T = jnp.tensordot(A, params['weights'],
                      axes=([1], [1])).transpose(0, 3, 1, 2)  # [B, V, 4, 4]
    rest_h = jnp.concatenate(
        [v_posed, jnp.ones((bsz, v_posed.shape[1], 1), DTYPE)], axis=2)
    v = jnp.matmul(T, rest_h[..., None])[..., 0][:, :, :3]
    result = v + trans[:, None, :]
    joints = jnp.tensordot(result, params['joint_regressor'].T,
                           axes=([1], [0])).transpose(0, 2, 1)
    return result, joints


if __name__ == "__main__":
    key = jax.random.PRNGKey(0)
    keys = jax.random.split(key, 8)
    B = 2
    V = 760  # small synthetic vertex count (real SMPL: 6890); Vpad=768 -> 2 even tiles

    # Deterministic synthetic SMPL parameters (same shapes/roles as the pkl).
    jreg = jax.random.uniform(keys[0], (N_JOINTS, V), DTYPE)
    jreg = jreg / jnp.sum(jreg, axis=1, keepdims=True)
    weights = jax.nn.softmax(
        jax.random.normal(keys[1], (V, N_JOINTS), DTYPE), axis=1)
    params = {
        'J_regressor': jreg,
        # pkl has no 'joint_regressor' key -> falls back to J_regressor
        'joint_regressor': jreg,
        'weights': weights,
        'posedirs': 0.01 * jax.random.normal(keys[2], (V, 3, N_POSEDIR), DTYPE),
        'v_template': jax.random.normal(keys[3], (V, 3), DTYPE),
        'shapedirs': 0.01 * jax.random.normal(keys[4], (V, 3, N_BETAS), DTYPE),
    }
    betas = jax.random.normal(keys[5], (B, N_BETAS), DTYPE)
    pose = 0.3 * jax.random.normal(keys[6], (B, N_JOINTS * 3), DTYPE)
    trans = jax.random.normal(keys[7], (B, 3), DTYPE)

    prep, meta = prepare_params(params)
    # V=760 -> Vpad=768, tile=384, 2 tiles: exercises padding + an even
    # multi-tile parallel grid (real SMPL: Vpad=6912 -> 2 tiles of 3456).
    assert meta['n_tiles'] == 2 and meta['v_tile'] == 384

    fwd = jax.jit(functools.partial(
        smpl_forward, n_verts=meta['n_verts'], v_tile=meta['v_tile']))
    verts, joints = fwd(prep, betas, pose, trans)
    jax.block_until_ready((verts, joints))

    ref_verts, ref_joints = smpl_forward_reference(params, betas, pose, trans)
    np.testing.assert_allclose(np.asarray(verts), np.asarray(ref_verts),
                               rtol=5e-2, atol=5e-2)
    np.testing.assert_allclose(np.asarray(joints), np.asarray(ref_joints),
                               rtol=5e-2, atol=5e-2)
    assert verts.shape == (B, V, 3) and joints.shape == (B, N_JOINTS, 3)
    print("KERNEL_OK")
</pallas_src>

<mosaic_0001>
module attributes {stable_mosaic.version = 11 : i64} {
  func.func @_smpl_kernel(%arg0: i32, %arg1: memref<2x224xbf16, #tpu.memory_space<vmem>>, %arg2: memref<32x24xbf16, #tpu.memory_space<vmem>>, %arg3: memref<3x224x384xbf16, #tpu.memory_space<vmem>>, %arg4: memref<3x384xf32, #tpu.memory_space<vmem>>, %arg5: memref<24x384xbf16, #tpu.memory_space<vmem>>, %arg6: memref<384x24xbf16, #tpu.memory_space<vmem>>, %arg7: memref<6x384xf32, #tpu.memory_space<vmem>>, %arg8: memref<1x3x2x24xf32, #tpu.memory_space<vmem>>) attributes {dimension_semantics = [#tpu.dimension_semantics<parallel>], iteration_bounds = array<i64: 2>, scalar_prefetch = 0 : i64, scratch_operands = 0 : i64, tpu.core_type = #tpu.core_type<tc>, window_params = [{pipeline_mode = #tpu.pipeline_mode<synchronous>, transform_indices = @transform_0, window_bounds = array<i64: 2, 224>}, {pipeline_mode = #tpu.pipeline_mode<synchronous>, transform_indices = @transform_1, window_bounds = array<i64: 32, 24>}, {transform_indices = @transform_2, window_bounds = array<i64: 3, 224, 384>}, {transform_indices = @transform_3, window_bounds = array<i64: 3, 384>}, {transform_indices = @transform_4, window_bounds = array<i64: 24, 384>}, {transform_indices = @transform_5, window_bounds = array<i64: 384, 24>}, {transform_indices = @transform_6, window_bounds = array<i64: 6, 384>}, {transform_indices = @transform_7, window_bounds = array<i64: 1, 3, 2, 24>}]} {
    %c0 = arith.constant 0 : index
    %c0_0 = arith.constant 0 : index
    %0 = vector.load %arg1[%c0, %c0_0] : memref<2x224xbf16, #tpu.memory_space<vmem>>, vector<2x224xbf16>
    %c0_1 = arith.constant 0 : index
    %c0_2 = arith.constant 0 : index
    %1 = vector.load %arg2[%c0_1, %c0_2] : memref<32x24xbf16, #tpu.memory_space<vmem>>, vector<32x24xbf16>
    %c0_3 = arith.constant 0 : index
    %c0_4 = arith.constant 0 : index
    %2 = vector.load %arg5[%c0_3, %c0_4] : memref<24x384xbf16, #tpu.memory_space<vmem>>, vector<24x384xbf16>
    %cst = arith.constant dense<0.000000e+00> : vector<32x384xf32>
    %3 = tpu.matmul %1, %2, %cst {dimension_numbers = #tpu.dot_dimension_numbers<[1], [0], [0], [1], [0, 0, 1, 1], [], []>} : vector<32x24xbf16>, vector<24x384xbf16>, vector<32x384xf32> -> vector<32x384xf32>
    %c0_5 = arith.constant 0 : index
    %c0_6 = arith.constant 0 : index
    %c0_7 = arith.constant 0 : index
    %4 = vector.load %arg3[%c0_5, %c0_6, %c0_7] : memref<3x224x384xbf16, #tpu.memory_space<vmem>>, vector<1x224x384xbf16>
    %5 = vector.shape_cast %4 : vector<1x224x384xbf16> to vector<224x384xbf16>
    %cst_8 = arith.constant dense<0.000000e+00> : vector<2x384xf32>
    %6 = tpu.matmul %0, %5, %cst_8 {dimension_numbers = #tpu.dot_dimension_numbers<[1], [0], [0], [1], [0, 0, 1, 1], [], []>} : vector<2x224xbf16>, vector<224x384xbf16>, vector<2x384xf32> -> vector<2x384xf32>
    %c0_9 = arith.constant 0 : index
    %c0_10 = arith.constant 0 : index
    %7 = vector.load %arg4[%c0_9, %c0_10] : memref<3x384xf32, #tpu.memory_space<vmem>>, vector<1x384xf32>
    %8 = vector.broadcast %7 : vector<1x384xf32> to vector<2x384xf32>
    %9 = arith.addf %8, %6 : vector<2x384xf32>
    %c1 = arith.constant 1 : index
    %c0_11 = arith.constant 0 : index
    %c0_12 = arith.constant 0 : index
    %10 = vector.load %arg3[%c1, %c0_11, %c0_12] : memref<3x224x384xbf16, #tpu.memory_space<vmem>>, vector<1x224x384xbf16>
    %11 = vector.shape_cast %10 : vector<1x224x384xbf16> to vector<224x384xbf16>
    %cst_13 = arith.constant dense<0.000000e+00> : vector<2x384xf32>
    %12 = tpu.matmul %0, %11, %cst_13 {dimension_numbers = #tpu.dot_dimension_numbers<[1], [0], [0], [1], [0, 0, 1, 1], [], []>} : vector<2x224xbf16>, vector<224x384xbf16>, vector<2x384xf32> -> vector<2x384xf32>
    %c1_14 = arith.constant 1 : index
    %c0_15 = arith.constant 0 : index
    %13 = vector.load %arg4[%c1_14, %c0_15] : memref<3x384xf32, #tpu.memory_space<vmem>>, vector<1x384xf32>
    %14 = vector.broadcast %13 : vector<1x384xf32> to vector<2x384xf32>
    %15 = arith.addf %14, %12 : vector<2x384xf32>
    %c2 = arith.constant 2 : index
    %c0_16 = arith.constant 0 : index
    %c0_17 = arith.constant 0 : index
    %16 = vector.load %arg3[%c2, %c0_16, %c0_17] : memref<3x224x384xbf16, #tpu.memory_space<vmem>>, vector<1x224x384xbf16>
    %17 = vector.shape_cast %16 : vector<1x224x384xbf16> to vector<224x384xbf16>
    %cst_18 = arith.constant dense<0.000000e+00> : vector<2x384xf32>
    %18 = tpu.matmul %0, %17, %cst_18 {dimension_numbers = #tpu.dot_dimension_numbers<[1], [0], [0], [1], [0, 0, 1, 1], [], []>} : vector<2x224xbf16>, vector<224x384xbf16>, vector<2x384xf32> -> vector<2x384xf32>
    %c2_19 = arith.constant 2 : index
    %c0_20 = arith.constant 0 : index
    %19 = vector.load %arg4[%c2_19, %c0_20] : memref<3x384xf32, #tpu.memory_space<vmem>>, vector<1x384xf32>
    %20 = vector.broadcast %19 : vector<1x384xf32> to vector<2x384xf32>
    %21 = arith.addf %20, %18 : vector<2x384xf32>
    %c0_21 = arith.constant 0 : index
    %c0_22 = arith.constant 0 : index
    %22 = vector.load %arg6[%c0_21, %c0_22] : memref<384x24xbf16, #tpu.memory_space<vmem>>, vector<384x24xbf16>
    %23 = vector.extract_strided_slice %3 {offsets = [0, 0], sizes = [2, 384], strides = [1, 1]} : vector<32x384xf32> to vector<2x384xf32>
    %24 = arith.mulf %23, %9 : vector<2x384xf32>
    %25 = vector.extract_strided_slice %3 {offsets = [2, 0], sizes = [2, 384], strides = [1, 1]} : vector<32x384xf32> to vector<2x384xf32>
    %26 = arith.mulf %25, %15 : vector<2x384xf32>
    %27 = arith.addf %24, %26 : vector<2x384xf32>
    %28 = vector.extract_strided_slice %3 {offsets = [4, 0], sizes = [2, 384], strides = [1, 1]} : vector<32x384xf32> to vector<2x384xf32>
    %29 = arith.mulf %28, %21 : vector<2x384xf32>
    %30 = arith.addf %27, %29 : vector<2x384xf32>
    %31 = vector.extract_strided_slice %3 {offsets = [6, 0], sizes = [2, 384], strides = [1, 1]} : vector<32x384xf32> to vector<2x384xf32>
    %32 = arith.addf %30, %31 : vector<2x384xf32>
    %c0_23 = arith.constant 0 : index
    %c0_24 = arith.constant 0 : index
    %33 = vector.load %arg7[%c0_23, %c0_24] : memref<6x384xf32, #tpu.memory_space<vmem>>, vector<2x384xf32>
    tpu.vector_store %arg7[%c0_23, %c0_24], %32 {strides = array<i32>} : memref<6x384xf32, #tpu.memory_space<vmem>>, vector<2x384xf32>,
    %cst_25 = arith.constant dense<0.000000e+00> : vector<2x24xf32>
    %34 = tpu.matmul %32, %22, %cst_25 {dimension_numbers = #tpu.dot_dimension_numbers<[1], [0], [0], [1], [0, 0, 1, 1], [], []>} : vector<2x384xf32>, vector<384x24xbf16>, vector<2x24xf32> -> vector<2x24xf32>
    %c0_26 = arith.constant 0 : index
    %c0_27 = arith.constant 0 : index
    %c0_28 = arith.constant 0 : index
    %c0_29 = arith.constant 0 : index
    %35 = vector.load %arg8[%c0_26, %c0_27, %c0_28, %c0_29] : memref<1x3x2x24xf32, #tpu.memory_space<vmem>>, vector<1x1x2x24xf32>
    %36 = vector.shape_cast %35 : vector<1x1x2x24xf32> to vector<2x24xf32>
    %37 = vector.shape_cast %34 : vector<2x24xf32> to vector<1x1x2x24xf32>
    tpu.vector_store %arg8[%c0_26, %c0_27, %c0_28, %c0_29], %37 {strides = array<i32>} : memref<1x3x2x24xf32, #tpu.memory_space<vmem>>, vector<1x1x2x24xf32>,
    %38 = vector.extract_strided_slice %3 {offsets = [8, 0], sizes = [2, 384], strides = [1, 1]} : vector<32x384xf32> to vector<2x384xf32>
    %39 = arith.mulf %38, %9 : vector<2x384xf32>
    %40 = vector.extract_strided_slice %3 {offsets = [10, 0], sizes = [2, 384], strides = [1, 1]} : vector<32x384xf32> to vector<2x384xf32>
    %41 = arith.mulf %40, %15 : vector<2x384xf32>
    %42 = arith.addf %39, %41 : vector<2x384xf32>
    %43 = vector.extract_strided_slice %3 {offsets = [12, 0], sizes = [2, 384], strides = [1, 1]} : vector<32x384xf32> to vector<2x384xf32>
    %44 = arith.mulf %43, %21 : vector<2x384xf32>
    %45 = arith.addf %42, %44 : vector<2x384xf32>
    %46 = vector.extract_strided_slice %3 {offsets = [14, 0], sizes = [2, 384], strides = [1, 1]} : vector<32x384xf32> to vector<2x384xf32>
    %47 = arith.addf %45, %46 : vector<2x384xf32>
    %c2_30 = arith.constant 2 : index
    %c0_31 = arith.constant 0 : index
    %48 = vector.load %arg7[%c2_30, %c0_31] : memref<6x384xf32, #tpu.memory_space<vmem>>, vector<2x384xf32>
    tpu.vector_store %arg7[%c2_30, %c0_31], %47 {strides = array<i32>} : memref<6x384xf32, #tpu.memory_space<vmem>>, vector<2x384xf32>,
    %cst_32 = arith.constant dense<0.000000e+00> : vector<2x24xf32>
    %49 = tpu.matmul %47, %22, %cst_32 {dimension_numbers = #tpu.dot_dimension_numbers<[1], [0], [0], [1], [0, 0, 1, 1], [], []>} : vector<2x384xf32>, vector<384x24xbf16>, vector<2x24xf32> -> vector<2x24xf32>
    %c0_33 = arith.constant 0 : index
    %c1_34 = arith.constant 1 : index
    %c0_35 = arith.constant 0 : index
    %c0_36 = arith.constant 0 : index
    %50 = vector.load %arg8[%c0_33, %c1_34, %c0_35, %c0_36] : memref<1x3x2x24xf32, #tpu.memory_space<vmem>>, vector<1x1x2x24xf32>
    %51 = vector.shape_cast %50 : vector<1x1x2x24xf32> to vector<2x24xf32>
    %52 = vector.shape_cast %49 : vector<2x24xf32> to vector<1x1x2x24xf32>
    tpu.vector_store %arg8[%c0_33, %c1_34, %c0_35, %c0_36], %52 {strides = array<i32>} : memref<1x3x2x24xf32, #tpu.memory_space<vmem>>, vector<1x1x2x24xf32>,
    %53 = vector.extract_strided_slice %3 {offsets = [16, 0], sizes = [2, 384], strides = [1, 1]} : vector<32x384xf32> to vector<2x384xf32>
    %54 = arith.mulf %53, %9 : vector<2x384xf32>
    %55 = vector.extract_strided_slice %3 {offsets = [18, 0], sizes = [2, 384], strides = [1, 1]} : vector<32x384xf32> to vector<2x384xf32>
    %56 = arith.mulf %55, %15 : vector<2x384xf32>
    %57 = arith.addf %54, %56 : vector<2x384xf32>
    %58 = vector.extract_strided_slice %3 {offsets = [20, 0], sizes = [2, 384], strides = [1, 1]} : vector<32x384xf32> to vector<2x384xf32>
    %59 = arith.mulf %58, %21 : vector<2x384xf32>
    %60 = arith.addf %57, %59 : vector<2x384xf32>
    %61 = vector.extract_strided_slice %3 {offsets = [22, 0], sizes = [2, 384], strides = [1, 1]} : vector<32x384xf32> to vector<2x384xf32>
    %62 = arith.addf %60, %61 : vector<2x384xf32>
    %c4 = arith.constant 4 : index
    %c0_37 = arith.constant 0 : index
    %63 = vector.load %arg7[%c4, %c0_37] : memref<6x384xf32, #tpu.memory_space<vmem>>, vector<2x384xf32>
    tpu.vector_store %arg7[%c4, %c0_37], %62 {strides = array<i32>} : memref<6x384xf32, #tpu.memory_space<vmem>>, vector<2x384xf32>,
    %cst_38 = arith.constant dense<0.000000e+00> : vector<2x24xf32>
    %64 = tpu.matmul %62, %22, %cst_38 {dimension_numbers = #tpu.dot_dimension_numbers<[1], [0], [0], [1], [0, 0, 1, 1], [], []>} : vector<2x384xf32>, vector<384x24xbf16>, vector<2x24xf32> -> vector<2x24xf32>
    %c0_39 = arith.constant 0 : index
    %c2_40 = arith.constant 2 : index
    %c0_41 = arith.constant 0 : index
    %c0_42 = arith.constant 0 : index
    %65 = vector.load %arg8[%c0_39, %c2_40, %c0_41, %c0_42] : memref<1x3x2x24xf32, #tpu.memory_space<vmem>>, vector<1x1x2x24xf32>
    %66 = vector.shape_cast %65 : vector<1x1x2x24xf32> to vector<2x24xf32>
    %67 = vector.shape_cast %64 : vector<2x24xf32> to vector<1x1x2x24xf32>
    tpu.vector_store %arg8[%c0_39, %c2_40, %c0_41, %c0_42], %67 {strides = array<i32>} : memref<1x3x2x24xf32, #tpu.memory_space<vmem>>, vector<1x1x2x24xf32>,
    return
  }
  func.func @transform_0(%arg0: i32) -> (i32, i32) {
    %c0_i32 = arith.constant 0 : i32
    %c0_i32_0 = arith.constant 0 : i32
    %c0_i32_1 = arith.constant 0 : i32
    return %c0_i32, %c0_i32_0 : i32, i32
  }
  func.func @transform_1(%arg0: i32) -> (i32, i32) {
    %c0_i32 = arith.constant 0 : i32
    %c0_i32_0 = arith.constant 0 : i32
    %c0_i32_1 = arith.constant 0 : i32
    return %c0_i32, %c0_i32_0 : i32, i32
  }
  func.func @transform_2(%arg0: i32) -> (i32, i32, i32) {
    %c0_i32 = arith.constant 0 : i32
    %c0_i32_0 = arith.constant 0 : i32
    %c0_i32_1 = arith.constant 0 : i32
    return %c0_i32, %c0_i32_0, %arg0 : i32, i32, i32
  }
  func.func @transform_3(%arg0: i32) -> (i32, i32) {
    %c0_i32 = arith.constant 0 : i32
    %c0_i32_0 = arith.constant 0 : i32
    return %c0_i32, %arg0 : i32, i32
  }
  func.func @transform_4(%arg0: i32) -> (i32, i32) {
    %c0_i32 = arith.constant 0 : i32
    %c0_i32_0 = arith.constant 0 : i32
    return %c0_i32, %arg0 : i32, i32
  }
  func.func @transform_5(%arg0: i32) -> (i32, i32) {
    %c0_i32 = arith.constant 0 : i32
    %c0_i32_0 = arith.constant 0 : i32
    return %arg0, %c0_i32 : i32, i32
  }
  func.func @transform_6(%arg0: i32) -> (i32, i32) {
    %c0_i32 = arith.constant 0 : i32
    %c0_i32_0 = arith.constant 0 : i32
    return %c0_i32, %arg0 : i32, i32
  }
  func.func @transform_7(%arg0: i32) -> (i32, i32, i32, i32) {
    %c0_i32 = arith.constant 0 : i32
    %c0_i32_0 = arith.constant 0 : i32
    %c0_i32_1 = arith.constant 0 : i32
    %c0_i32_2 = arith.constant 0 : i32
    return %arg0, %c0_i32, %c0_i32_0, %c0_i32_1 : i32, i32, i32, i32
  }
}

</mosaic_0001>

<bundles_post_ra>
// kernel: smpl_forward.1
= control target key start
LH: loop header
LB: loop body
LE: loop exit
PB: predicated region body
PF: predicated region fallthrough
CT: control target
= control target key end

     0   :  { %s3780_s24 = smov 0   ;;  %s3782_s25 = smov 0   ;;  %s4707_s0 = inlined_call_operand.vmem [shape: bf16[2,224], index: 0, kind: input, shape index: {}]   ;;  %s4708_s1 = inlined_call_operand.vmem [shape: bf16[32,24], index: 1, kind: input, shape index: {}]   ;;  %s4709_s2 = inlined_call_operand.vmem [shape: bf16[3,224,768], index: 2, kind: input, shape index: {}]   ;;  %s4710_s3 = inlined_call_operand.vmem [shape: f32[3,768], index: 3, kind: input, shape index: {}]   ;;  %s4711_s4 = inlined_call_operand.vmem [shape: bf16[24,768], index: 4, kind: input, shape index: {}]   ;;  %s4712_s5 = inlined_call_operand.vmem [shape: bf16[768,24], index: 5, kind: input, shape index: {}]   ;;  %s4713_s6 = inlined_call_operand.vmem [shape: f32[6,768], index: 6, kind: output, shape index: {0}]   ;;  %s4714_s7 = inlined_call_operand.vmem [shape: f32[2,3,2,24], index: 7, kind: output, shape index: {1}]  }
   0x1   :  { %s3784_s26 = smov 0  }
   0x2 LB: > { %s3796_s27 = sadd.s32 4294967295, %s3734_s26   ;;  %s3799_s28 = sadd.s32 1, %s3734_s26   ;;  %s3734_s26 = sphi %s3784_s26, %s4752_s26   ;;  %s3730_s25 = sphi %s3782_s25, %s4751_s25   ;;  %s3726_s24 = sphi %s3780_s24, %s4750_s24  }
   0x3   : > { %s64_s29 = ssub.s32 %s3734_s26, %s3799_s28  ;;  %s67_s30 = sadd.s32 1, %s3730_s25 }
   0x4   : > { %p65_p0 = scmp.eq.s32.totalorder %s64_s29, 0  ;;  %p74_p1 = scmp.ne.s32.totalorder %s3730_s25, %s3726_s24 }
   0x5   : > { %p75_p2 = scmp.eq.s32.totalorder %s3734_s26, 0  ;;  %p2852_p4 = scmp.ge.s32.totalorder %s3734_s26, 2 }
   0x6   : > { %s3808_s8 = scalar_select %p65_p0, %s3730_s25, %s67_s30  }
   0x7   : > { %p3810_p3 = por %p75_p2, %p74_p1  ;;  %236 = sbr.rel (%p2852_p4) target bundleno = 125 (0x7d), region = 24 }
   0xe   : > { %239 = sbr.rel (!%p3810_p3) target bundleno = 117 (0x75), region = 28  ;;  %s241_s10 = sand.u32 (%p3810_p3), 1, %s3730_s25  }
   0xf   : > { %s3322_s11 = smul.u32 (%p3810_p3), 12, %s3734_s26 }
  0x10   : > { %s3478_s12 = smul.u32 (%p3810_p3), 1008, %s241_s10 }
  0x11   : > { %s3822_s15 = scalar_lea.vmem (%p3810_p3), %s4709_s2, %s3322_s11 }
  0x12   : > { %v261_v0 = vld [vmem:[%s3822_s15] sm:$0xff] (%p3810_p3)  ;;  %v263_v1 = vld [vmem:[%s3822_s15 + $0x18] sm:$0xff] (%p3810_p3)  ;;  %v265_v2 = vld [vmem:[%s3822_s15 + $0x30] sm:$0xff] (%p3810_p3)  ;;  %s3827_s16 = scalar_lea.vmem (%p3810_p3), [#allocation2], %s3478_s12 }
  0x13   : > { %262 = vst [vmem:[%s3827_s16] sm:$0xff] (%p3810_p3), %v261_v0  ;;  %264 = vst [vmem:[%s3827_s16 + $0xc] sm:$0xff] (%p3810_p3), %v263_v1  ;;  %v267_v3 = vld [vmem:[%s3822_s15 + $0x48] sm:$0xff] (%p3810_p3)  ;;  %v269_v4 = vld [vmem:[%s3822_s15 + $0x60] sm:$0xff] (%p3810_p3) }
  0x14   : > { %266 = vst [vmem:[%s3827_s16 + $0x18] sm:$0xff] (%p3810_p3), %v265_v2  ;;  %v271_v5 = vld [vmem:[%s3822_s15 + $0x78] sm:$0xff] (%p3810_p3)  ;;  %268 = vst [vmem:[%s3827_s16 + $0x24] sm:$0xff] (%p3810_p3), %v267_v3  ;;  %v273_v6 = vld [vmem:[%s3822_s15 + $0x90] sm:$0xff] (%p3810_p3) }
  0x15   : > { %270 = vst [vmem:[%s3827_s16 + $0x30] sm:$0xff] %v269_v4  ;;  %272 = vst [vmem:[%s3827_s16 + $0x3c] sm:$0xff] %v271_v5  ;;  %v275_v7 = vld [vmem:[%s3822_s15 + $0xa8] sm:$0xff]  ;;  %v277_v8 = vld [vmem:[%s3822_s15 + $0xc0] sm:$0xff] }
  0x16   : > { %274 = vst [vmem:[%s3827_s16 + $0x48] sm:$0xff] %v273_v6  ;;  %276 = vst [vmem:[%s3827_s16 + $0x54] sm:$0xff] %v275_v7  ;;  %v279_v9 = vld [vmem:[%s3822_s15 + $0xd8] sm:$0xff]  ;;  %v281_v10 = vld [vmem:[%s3822_s15 + $0xf0] sm:$0xff] }
  0x17   : > { %278 = vst [vmem:[%s3827_s16 + $0x60] sm:$0xff] %v277_v8  ;;  %v283_v11 = vld [vmem:[%s3822_s15 + $0x108] sm:$0xff]  ;;  %280 = vst [vmem:[%s3827_s16 + $0x6c] sm:$0xff] %v279_v9  ;;  %v285_v12 = vld [vmem:[%s3822_s15 + $0x120] sm:$0xff] }
  0x18   : > { %282 = vst [vmem:[%s3827_s16 + $0x78] sm:$0xff] %v281_v10  ;;  %284 = vst [vmem:[%s3827_s16 + $0x84] sm:$0xff] %v283_v11  ;;  %v287_v13 = vld [vmem:[%s3822_s15 + $0x138] sm:$0xff]  ;;  %v289_v14 = vld [vmem:[%s3822_s15 + $0x150] sm:$0xff] }
  0x19   : > { %286 = vst [vmem:[%s3827_s16 + $0x90] sm:$0xff] %v285_v12  ;;  %288 = vst [vmem:[%s3827_s16 + $0x9c] sm:$0xff] %v287_v13  ;;  %v291_v15 = vld [vmem:[%s3822_s15 + $0x168] sm:$0xff]  ;;  %v293_v16 = vld [vmem:[%s3822_s15 + $0x180] sm:$0xff] }
  0x1a   : > { %290 = vst [vmem:[%s3827_s16 + $0xa8] sm:$0xff] %v289_v14  ;;  %v295_v17 = vld [vmem:[%s3822_s15 + $0x198] sm:$0xff]  ;;  %292 = vst [vmem:[%s3827_s16 + $0xb4] sm:$0xff] %v291_v15  ;;  %v297_v18 = vld [vmem:[%s3822_s15 + $0x1b0] sm:$0xff] }
  0x1b   : > { %294 = vst [vmem:[%s3827_s16 + $0xc0] sm:$0xff] %v293_v16  ;;  %296 = vst [vmem:[%s3827_s16 + $0xcc] sm:$0xff] %v295_v17  ;;  %v299_v19 = vld [vmem:[%s3822_s15 + $0x1c8] sm:$0xff]  ;;  %v301_v20 = vld [vmem:[%s3822_s15 + $0x1e0] sm:$0xff] }
  0x1c   : > { %298 = vst [vmem:[%s3827_s16 + $0xd8] sm:$0xff] %v297_v18  ;;  %300 = vst [vmem:[%s3827_s16 + $0xe4] sm:$0xff] %v299_v19  ;;  %v303_v21 = vld [vmem:[%s3822_s15 + $0x1f8] sm:$0xff]  ;;  %v305_v22 = vld [vmem:[%s3822_s15 + $0x210] sm:$0xff] }
  0x1d   : > { %302 = vst [vmem:[%s3827_s16 + $0xf0] sm:$0xff] %v301_v20  ;;  %v307_v23 = vld [vmem:[%s3822_s15 + $0x228] sm:$0xff]  ;;  %304 = vst [vmem:[%s3827_s16 + $0xfc] sm:$0xff] %v303_v21  ;;  %v309_v24 = vld [vmem:[%s3822_s15 + $0x240] sm:$0xff] }
  0x1e   : > { %306 = vst [vmem:[%s3827_s16 + $0x108] sm:$0xff] %v305_v22  ;;  %308 = vst [vmem:[%s3827_s16 + $0x114] sm:$0xff] %v307_v23  ;;  %v311_v25 = vld [vmem:[%s3822_s15 + $0x258] sm:$0xff]  ;;  %v313_v26 = vld [vmem:[%s3822_s15 + $0x270] sm:$0xff] }
  0x1f   : > { %310 = vst [vmem:[%s3827_s16 + $0x120] sm:$0xff] %v309_v24  ;;  %312 = vst [vmem:[%s3827_s16 + $0x12c] sm:$0xff] %v311_v25  ;;  %v315_v27 = vld [vmem:[%s3822_s15 + $0x288] sm:$0xff]  ;;  %v317_v28 = vld [vmem:[%s3822_s15 + $0x2a0] sm:$0xff] }
  0x20   : > { %314 = vst [vmem:[%s3827_s16 + $0x138] sm:$0xff] %v313_v26  ;;  %v319_v29 = vld [vmem:[%s3822_s15 + $0x2b8] sm:$0xff]  ;;  %316 = vst [vmem:[%s3827_s16 + $0x144] sm:$0xff] %v315_v27  ;;  %v321_v30 = vld [vmem:[%s3822_s15 + $0x2d0] sm:$0xff] }
  0x21   : > { %318 = vst [vmem:[%s3827_s16 + $0x150] sm:$0xff] %v317_v28  ;;  %320 = vst [vmem:[%s3827_s16 + $0x15c] sm:$0xff] %v319_v29  ;;  %v323_v31 = vld [vmem:[%s3822_s15 + $0x2e8] sm:$0xff]  ;;  %v325_v32 = vld [vmem:[%s3822_s15 + $0x300] sm:$0xff] }
  0x22   : > { %322 = vst [vmem:[%s3827_s16 + $0x168] sm:$0xff] %v321_v30  ;;  %324 = vst [vmem:[%s3827_s16 + $0x174] sm:$0xff] %v323_v31  ;;  %v327_v33 = vld [vmem:[%s3822_s15 + $0x318] sm:$0xff]  ;;  %v329_v34 = vld [vmem:[%s3822_s15 + $0x330] sm:$0xff] }
  0x23   : > { %326 = vst [vmem:[%s3827_s16 + $0x180] sm:$0xff] %v325_v32  ;;  %v331_v35 = vld [vmem:[%s3822_s15 + $0x348] sm:$0xff]  ;;  %328 = vst [vmem:[%s3827_s16 + $0x18c] sm:$0xff] %v327_v33  ;;  %v333_v36 = vld [vmem:[%s3822_s15 + $0x360] sm:$0xff] }
  0x24   : > { %330 = vst [vmem:[%s3827_s16 + $0x198] sm:$0xff] %v329_v34  ;;  %332 = vst [vmem:[%s3827_s16 + $0x1a4] sm:$0xff] %v331_v35  ;;  %v335_v37 = vld [vmem:[%s3822_s15 + $0x378] sm:$0xff]  ;;  %v337_v38 = vld [vmem:[%s3822_s15 + $0x390] sm:$0xff] }
  0x25   : > { %334 = vst [vmem:[%s3827_s16 + $0x1b0] sm:$0xff] %v333_v36  ;;  %336 = vst [vmem:[%s3827_s16 + $0x1bc] sm:$0xff] %v335_v37  ;;  %v339_v39 = vld [vmem:[%s3822_s15 + $0x3a8] sm:$0xff]  ;;  %v341_v40 = vld [vmem:[%s3822_s15 + $0x3c0] sm:$0xff] }
  0x26   : > { %338 = vst [vmem:[%s3827_s16 + $0x1c8] sm:$0xff] %v337_v38  ;;  %v343_v41 = vld [vmem:[%s3822_s15 + $0x3d8] sm:$0xff]  ;;  %340 = vst [vmem:[%s3827_s16 + $0x1d4] sm:$0xff] %v339_v39  ;;  %v345_v42 = vld [vmem:[%s3822_s15 + $0x3f0] sm:$0xff] }
  0x27   : > { %342 = vst [vmem:[%s3827_s16 + $0x1e0] sm:$0xff] %v341_v40  ;;  %344 = vst [vmem:[%s3827_s16 + $0x1ec] sm:$0xff] %v343_v41  ;;  %v347_v43 = vld [vmem:[%s3822_s15 + $0x408] sm:$0xff]  ;;  %v349_v44 = vld [vmem:[%s3822_s15 + $0x420] sm:$0xff] }
  0x28   : > { %346 = vst [vmem:[%s3827_s16 + $0x1f8] sm:$0xff] %v345_v42  ;;  %348 = vst [vmem:[%s3827_s16 + $0x204] sm:$0xff] %v347_v43  ;;  %v351_v45 = vld [vmem:[%s3822_s15 + $0x438] sm:$0xff]  ;;  %v353_v46 = vld [vmem:[%s3822_s15 + $0x450] sm:$0xff] }
  0x29   : > { %350 = vst [vmem:[%s3827_s16 + $0x210] sm:$0xff] %v349_v44  ;;  %v355_v47 = vld [vmem:[%s3822_s15 + $0x468] sm:$0xff]  ;;  %352 = vst [vmem:[%s3827_s16 + $0x21c] sm:$0xff] %v351_v45  ;;  %v357_v48 = vld [vmem:[%s3822_s15 + $0x480] sm:$0xff] }
  0x2a   : > { %354 = vst [vmem:[%s3827_s16 + $0x228] sm:$0xff] %v353_v46  ;;  %356 = vst [vmem:[%s3827_s16 + $0x234] sm:$0xff] %v355_v47  ;;  %v359_v49 = vld [vmem:[%s3822_s15 + $0x498] sm:$0xff]  ;;  %v361_v50 = vld [vmem:[%s3822_s15 + $0x4b0] sm:$0xff] }
  0x2b   : > { %358 = vst [vmem:[%s3827_s16 + $0x240] sm:$0xff] %v357_v48  ;;  %360 = vst [vmem:[%s3827_s16 + $0x24c] sm:$0xff] %v359_v49  ;;  %v363_v51 = vld [vmem:[%s3822_s15 + $0x4c8] sm:$0xff]  ;;  %v365_v52 = vld [vmem:[%s3822_s15 + $0x4e0] sm:$0xff] }
  0x2c   : > { %362 = vst [vmem:[%s3827_s16 + $0x258] sm:$0xff] %v361_v50  ;;  %v367_v53 = vld [vmem:[%s3822_s15 + $0x4f8] sm:$0xff]  ;;  %364 = vst [vmem:[%s3827_s16 + $0x264] sm:$0xff] %v363_v51  ;;  %v369_v54 = vld [vmem:[%s3822_s15 + $0x510] sm:$0xff] }
  0x2d   : > { %366 = vst [vmem:[%s3827_s16 + $0x270] sm:$0xff] %v365_v52  ;;  %368 = vst [vmem:[%s3827_s16 + $0x27c] sm:$0xff] %v367_v53  ;;  %v371_v55 = vld [vmem:[%s3822_s15 + $0x528] sm:$0xff]  ;;  %v373_v56 = vld [vmem:[%s3822_s15 + $0x540] sm:$0xff] }
  0x2e   : > { %370 = vst [vmem:[%s3827_s16 + $0x288] sm:$0xff] %v369_v54  ;;  %372 = vst [vmem:[%s3827_s16 + $0x294] sm:$0xff] %v371_v55  ;;  %v375_v57 = vld [vmem:[%s3822_s15 + $0x558] sm:$0xff]  ;;  %v377_v58 = vld [vmem:[%s3822_s15 + $0x570] sm:$0xff] }
  0x2f   : > { %374 = vst [vmem:[%s3827_s16 + $0x2a0] sm:$0xff] %v373_v56  ;;  %v379_v59 = vld [vmem:[%s3822_s15 + $0x588] sm:$0xff]  ;;  %376 = vst [vmem:[%s3827_s16 + $0x2ac] sm:$0xff] %v375_v57  ;;  %v381_v60 = vld [vmem:[%s3822_s15 + $0x5a0] sm:$0xff] }
  0x30   : > { %378 = vst [vmem:[%s3827_s16 + $0x2b8] sm:$0xff] %v377_v58  ;;  %380 = vst [vmem:[%s3827_s16 + $0x2c4] sm:$0xff] %v379_v59  ;;  %v383_v61 = vld [vmem:[%s3822_s15 + $0x5b8] sm:$0xff]  ;;  %v385_v62 = vld [vmem:[%s3822_s15 + $0x5d0] sm:$0xff] }
  0x31   : > { %382 = vst [vmem:[%s3827_s16 + $0x2d0] sm:$0xff] %v381_v60  ;;  %384 = vst [vmem:[%s3827_s16 + $0x2dc] sm:$0xff] %v383_v61  ;;  %v387_v63 = vld [vmem:[%s3822_s15 + $0x5e8] sm:$0xff]  ;;  %v389_v0 = vld [vmem:[%s3822_s15 + $0x600] sm:$0xff] }
  0x32   : > { %386 = vst [vmem:[%s3827_s16 + $0x2e8] sm:$0xff] %v385_v62  ;;  %v391_v1 = vld [vmem:[%s3822_s15 + $0x618] sm:$0xff]  ;;  %388 = vst [vmem:[%s3827_s16 + $0x2f4] sm:$0xff] %v387_v63  ;;  %v393_v2 = vld [vmem:[%s3822_s15 + $0x630] sm:$0xff] }
  0x33   : > { %390 = vst [vmem:[%s3827_s16 + $0x300] sm:$0xff] %v389_v0  ;;  %392 = vst [vmem:[%s3827_s16 + $0x30c] sm:$0xff] %v391_v1  ;;  %v395_v3 = vld [vmem:[%s3822_s15 + $0x648] sm:$0xff]  ;;  %v397_v4 = vld [vmem:[%s3822_s15 + $0x660] sm:$0xff] }
  0x34   : > { %394 = vst [vmem:[%s3827_s16 + $0x318] sm:$0xff] %v393_v2  ;;  %396 = vst [vmem:[%s3827_s16 + $0x324] sm:$0xff] %v395_v3  ;;  %v399_v5 = vld [vmem:[%s3822_s15 + $0x678] sm:$0xff]  ;;  %v401_v6 = vld [vmem:[%s3822_s15 + $0x690] sm:$0xff] }
  0x35   : > { %398 = vst [vmem:[%s3827_s16 + $0x330] sm:$0xff] %v397_v4  ;;  %v403_v7 = vld [vmem:[%s3822_s15 + $0x6a8] sm:$0xff]  ;;  %400 = vst [vmem:[%s3827_s16 + $0x33c] sm:$0xff] %v399_v5  ;;  %v405_v8 = vld [vmem:[%s3822_s15 + $0x6c0] sm:$0xff] }
  0x36   : > { %402 = vst [vmem:[%s3827_s16 + $0x348] sm:$0xff] %v401_v6  ;;  %404 = vst [vmem:[%s3827_s16 + $0x354] sm:$0xff] %v403_v7  ;;  %v407_v9 = vld [vmem:[%s3822_s15 + $0x6d8] sm:$0xff]  ;;  %v409_v10 = vld [vmem:[%s3822_s15 + $0x6f0] sm:$0xff] }
  0x37   : > { %406 = vst [vmem:[%s3827_s16 + $0x360] sm:$0xff] %v405_v8  ;;  %408 = vst [vmem:[%s3827_s16 + $0x36c] sm:$0xff] %v407_v9  ;;  %v411_v11 = vld [vmem:[%s3822_s15 + $0x708] sm:$0xff]  ;;  %v413_v12 = vld [vmem:[%s3822_s15 + $0x720] sm:$0xff] }
  0x38   : > { %410 = vst [vmem:[%s3827_s16 + $0x378] sm:$0xff] %v409_v10  ;;  %v415_v13 = vld [vmem:[%s3822_s15 + $0x738] sm:$0xff]  ;;  %412 = vst [vmem:[%s3827_s16 + $0x384] sm:$0xff] %v411_v11  ;;  %v417_v14 = vld [vmem:[%s3822_s15 + $0x750] sm:$0xff] }
  0x39   : > { %414 = vst [vmem:[%s3827_s16 + $0x390] sm:$0xff] %v413_v12  ;;  %416 = vst [vmem:[%s3827_s16 + $0x39c] sm:$0xff] %v415_v13  ;;  %v419_v15 = vld [vmem:[%s3822_s15 + $0x768] sm:$0xff]  ;;  %v421_v16 = vld [vmem:[%s3822_s15 + $0x780] sm:$0xff] }
  0x3a   : > { %418 = vst [vmem:[%s3827_s16 + $0x3a8] sm:$0xff] %v417_v14  ;;  %420 = vst [vmem:[%s3827_s16 + $0x3b4] sm:$0xff] %v419_v15  ;;  %v423_v17 = vld [vmem:[%s3822_s15 + $0x798] sm:$0xff]  ;;  %v425_v18 = vld [vmem:[%s3822_s15 + $0x7b0] sm:$0xff] }
  0x3b   : > { %422 = vst [vmem:[%s3827_s16 + $0x3c0] sm:$0xff] %v421_v16  ;;  %v427_v19 = vld [vmem:[%s3822_s15 + $0x7c8] sm:$0xff]  ;;  %424 = vst [vmem:[%s3827_s16 + $0x3cc] sm:$0xff] %v423_v17  ;;  %v2856_v21 = vld [vmem:[%s3822_s15 + $0x20] sm:$0xf] }
  0x3c   : > { %426 = vst [vmem:[%s3827_s16 + $0x3d8] sm:$0xff] %v425_v18  ;;  %428 = vst [vmem:[%s3827_s16 + $0x3e4] sm:$0xff] %v427_v19  ;;  %v2854_v20 = vld [vmem:[%s3822_s15 + $0x8] sm:$0xf]  ;;  %v2858_v22 = vld [vmem:[%s3822_s15 + $0x38] sm:$0xf] }
  0x3d   : > { %2855 = vst [vmem:[%s3827_s16 + $0x8] sm:$0xf] %v2854_v20  ;;  %2857 = vst [vmem:[%s3827_s16 + $0x14] sm:$0xf] %v2856_v21  ;;  %v2860_v23 = vld [vmem:[%s3822_s15 + $0x50] sm:$0xf] }
  0x3e   : > { %2859 = vst [vmem:[%s3827_s16 + $0x20] sm:$0xf] %v2858_v22  ;;  %v2862_v24 = vld [vmem:[%s3822_s15 + $0x68] sm:$0xf]  ;;  %v2864_v25 = vld [vmem:[%s3822_s15 + $0x80] sm:$0xf] }
  0x3f   : > { %2861 = vst [vmem:[%s3827_s16 + $0x2c] sm:$0xf] %v2860_v23  ;;  %2863 = vst [vmem:[%s3827_s16 + $0x38] sm:$0xf] %v2862_v24  ;;  %v2866_v26 = vld [vmem:[%s3822_s15 + $0x98] sm:$0xf] }
  0x40   : > { %2865 = vst [vmem:[%s3827_s16 + $0x44] sm:$0xf] %v2864_v25  ;;  %v2868_v27 = vld [vmem:[%s3822_s15 + $0xb0] sm:$0xf]  ;;  %v2870_v28 = vld [vmem:[%s3822_s15 + $0xc8] sm:$0xf] }
  0x41   : > { %2867 = vst [vmem:[%s3827_s16 + $0x50] sm:$0xf] %v2866_v26  ;;  %2869 = vst [vmem:[%s3827_s16 + $0x5c] sm:$0xf] %v2868_v27  ;;  %v2872_v29 = vld [vmem:[%s3822_s15 + $0xe0] sm:$0xf] }
  0x42   : > { %2871 = vst [vmem:[%s3827_s16 + $0x68] sm:$0xf] %v2870_v28  ;;  %v2874_v30 = vld [vmem:[%s3822_s15 + $0xf8] sm:$0xf]  ;;  %v2876_v31 = vld [vmem:[%s3822_s15 + $0x110] sm:$0xf] }
  0x43   : > { %2873 = vst [vmem:[%s3827_s16 + $0x74] sm:$0xf] %v2872_v29  ;;  %2875 = vst [vmem:[%s3827_s16 + $0x80] sm:$0xf] %v2874_v30  ;;  %v2878_v32 = vld [vmem:[%s3822_s15 + $0x128] sm:$0xf] }
  0x44   : > { %2877 = vst [vmem:[%s3827_s16 + $0x8c] sm:$0xf] %v2876_v31  ;;  %v2880_v33 = vld [vmem:[%s3822_s15 + $0x140] sm:$0xf]  ;;  %v2882_v34 = vld [vmem:[%s3822_s15 + $0x158] sm:$0xf] }
  0x45   : > { %2879 = vst [vmem:[%s3827_s16 + $0x98] sm:$0xf] %v2878_v32  ;;  %2881 = vst [vmem:[%s3827_s16 + $0xa4] sm:$0xf] %v2880_v33  ;;  %v2884_v35 = vld [vmem:[%s3822_s15 + $0x170] sm:$0xf] }
  0x46   : > { %2883 = vst [vmem:[%s3827_s16 + $0xb0] sm:$0xf] %v2882_v34  ;;  %v2886_v36 = vld [vmem:[%s3822_s15 + $0x188] sm:$0xf]  ;;  %v2888_v37 = vld [vmem:[%s3822_s15 + $0x1a0] sm:$0xf] }
  0x47   : > { %2885 = vst [vmem:[%s3827_s16 + $0xbc] sm:$0xf] %v2884_v35  ;;  %2887 = vst [vmem:[%s3827_s16 + $0xc8] sm:$0xf] %v2886_v36  ;;  %v2890_v38 = vld [vmem:[%s3822_s15 + $0x1b8] sm:$0xf] }
  0x48   : > { %2889 = vst [vmem:[%s3827_s16 + $0xd4] sm:$0xf] %v2888_v37  ;;  %v2892_v39 = vld [vmem:[%s3822_s15 + $0x1d0] sm:$0xf]  ;;  %v2894_v40 = vld [vmem:[%s3822_s15 + $0x1e8] sm:$0xf] }
  0x49   : > { %2891 = vst [vmem:[%s3827_s16 + $0xe0] sm:$0xf] %v2890_v38  ;;  %2893 = vst [vmem:[%s3827_s16 + $0xec] sm:$0xf] %v2892_v39  ;;  %v2896_v41 = vld [vmem:[%s3822_s15 + $0x200] sm:$0xf] }
  0x4a   : > { %2895 = vst [vmem:[%s3827_s16 + $0xf8] sm:$0xf] %v2894_v40  ;;  %v2898_v42 = vld [vmem:[%s3822_s15 + $0x218] sm:$0xf]  ;;  %v2900_v43 = vld [vmem:[%s3822_s15 + $0x230] sm:$0xf] }
  0x4b   : > { %2897 = vst [vmem:[%s3827_s16 + $0x104] sm:$0xf] %v2896_v41  ;;  %2899 = vst [vmem:[%s3827_s16 + $0x110] sm:$0xf] %v2898_v42  ;;  %v2902_v44 = vld [vmem:[%s3822_s15 + $0x248] sm:$0xf] }
  0x4c   : > { %2901 = vst [vmem:[%s3827_s16 + $0x11c] sm:$0xf] %v2900_v43  ;;  %v2904_v45 = vld [vmem:[%s3822_s15 + $0x260] sm:$0xf]  ;;  %v2906_v46 = vld [vmem:[%s3822_s15 + $0x278] sm:$0xf] }
  0x4d   : > { %2903 = vst [vmem:[%s3827_s16 + $0x128] sm:$0xf] %v2902_v44  ;;  %2905 = vst [vmem:[%s3827_s16 + $0x134] sm:$0xf] %v2904_v45  ;;  %v2908_v47 = vld [vmem:[%s3822_s15 + $0x290] sm:$0xf] }
  0x4e   : > { %2907 = vst [vmem:[%s3827_s16 + $0x140] sm:$0xf] %v2906_v46  ;;  %v2910_v48 = vld [vmem:[%s3822_s15 + $0x2a8] sm:$0xf]  ;;  %v2912_v49 = vld [vmem:[%s3822_s15 + $0x2c0] sm:$0xf] }
  0x4f   : > { %2909 = vst [vmem:[%s3827_s16 + $0x14c] sm:$0xf] %v2908_v47  ;;  %2911 = vst [vmem:[%s3827_s16 + $0x158] sm:$0xf] %v2910_v48  ;;  %v2914_v50 = vld [vmem:[%s3822_s15 + $0x2d8] sm:$0xf] }
  0x50   : > { %2913 = vst [vmem:[%s3827_s16 + $0x164] sm:$0xf] %v2912_v49  ;;  %v2916_v51 = vld [vmem:[%s3822_s15 + $0x2f0] sm:$0xf]  ;;  %v2918_v52 = vld [vmem:[%s3822_s15 + $0x308] sm:$0xf] }
  0x51   : > { %2915 = vst [vmem:[%s3827_s16 + $0x170] sm:$0xf] %v2914_v50  ;;  %2917 = vst [vmem:[%s3827_s16 + $0x17c] sm:$0xf] %v2916_v51  ;;  %v2920_v53 = vld [vmem:[%s3822_s15 + $0x320] sm:$0xf] }
  0x52   : > { %2919 = vst [vmem:[%s3827_s16 + $0x188] sm:$0xf] %v2918_v52  ;;  %v2922_v54 = vld [vmem:[%s3822_s15 + $0x338] sm:$0xf]  ;;  %v2924_v55 = vld [vmem:[%s3822_s15 + $0x350] sm:$0xf] }
  0x53   : > { %2921 = vst [vmem:[%s3827_s16 + $0x194] sm:$0xf] %v2920_v53  ;;  %2923 = vst [vmem:[%s3827_s16 + $0x1a0] sm:$0xf] %v2922_v54  ;;  %v2926_v56 = vld [vmem:[%s3822_s15 + $0x368] sm:$0xf] }
  0x54   : > { %2925 = vst [vmem:[%s3827_s16 + $0x1ac] sm:$0xf] %v2924_v55  ;;  %v2928_v57 = vld [vmem:[%s3822_s15 + $0x380] sm:$0xf]  ;;  %v2930_v58 = vld [vmem:[%s3822_s15 + $0x398] sm:$0xf] }
  0x55   : > { %2927 = vst [vmem:[%s3827_s16 + $0x1b8] sm:$0xf] %v2926_v56  ;;  %2929 = vst [vmem:[%s3827_s16 + $0x1c4] sm:$0xf] %v2928_v57  ;;  %v2932_v59 = vld [vmem:[%s3822_s15 + $0x3b0] sm:$0xf] }
  0x56   : > { %2931 = vst [vmem:[%s3827_s16 + $0x1d0] sm:$0xf] %v2930_v58  ;;  %v2934_v60 = vld [vmem:[%s3822_s15 + $0x3c8] sm:$0xf]  ;;  %v2936_v61 = vld [vmem:[%s3822_s15 + $0x3e0] sm:$0xf] }
  0x57   : > { %2933 = vst [vmem:[%s3827_s16 + $0x1dc] sm:$0xf] %v2932_v59  ;;  %2935 = vst [vmem:[%s3827_s16 + $0x1e8] sm:$0xf] %v2934_v60  ;;  %v2938_v62 = vld [vmem:[%s3822_s15 + $0x3f8] sm:$0xf] }
  0x58   : > { %2937 = vst [vmem:[%s3827_s16 + $0x1f4] sm:$0xf] %v2936_v61  ;;  %v2940_v63 = vld [vmem:[%s3822_s15 + $0x410] sm:$0xf]  ;;  %v2942_v0 = vld [vmem:[%s3822_s15 + $0x428] sm:$0xf] }
  0x59   : > { %2939 = vst [vmem:[%s3827_s16 + $0x200] sm:$0xf] %v2938_v62  ;;  %2941 = vst [vmem:[%s3827_s16 + $0x20c] sm:$0xf] %v2940_v63  ;;  %v2944_v1 = vld [vmem:[%s3822_s15 + $0x440] sm:$0xf] }
  0x5a   : > { %2943 = vst [vmem:[%s3827_s16 + $0x218] sm:$0xf] %v2942_v0  ;;  %v2946_v2 = vld [vmem:[%s3822_s15 + $0x458] sm:$0xf]  ;;  %v2948_v3 = vld [vmem:[%s3822_s15 + $0x470] sm:$0xf] }
  0x5b   : > { %2945 = vst [vmem:[%s3827_s16 + $0x224] sm:$0xf] %v2944_v1  ;;  %2947 = vst [vmem:[%s3827_s16 + $0x230] sm:$0xf] %v2946_v2  ;;  %v2950_v4 = vld [vmem:[%s3822_s15 + $0x488] sm:$0xf] }
  0x5c   : > { %2949 = vst [vmem:[%s3827_s16 + $0x23c] sm:$0xf] %v2948_v3  ;;  %v2952_v5 = vld [vmem:[%s3822_s15 + $0x4a0] sm:$0xf]  ;;  %v2954_v6 = vld [vmem:[%s3822_s15 + $0x4b8] sm:$0xf] }
  0x5d   : > { %2951 = vst [vmem:[%s3827_s16 + $0x248] sm:$0xf] %v2950_v4  ;;  %2953 = vst [vmem:[%s3827_s16 + $0x254] sm:$0xf] %v2952_v5  ;;  %v2956_v7 = vld [vmem:[%s3822_s15 + $0x4d0] sm:$0xf] }
  0x5e   : > { %2955 = vst [vmem:[%s3827_s16 + $0x260] sm:$0xf] %v2954_v6  ;;  %v2958_v8 = vld [vmem:[%s3822_s15 + $0x4e8] sm:$0xf]  ;;  %v2960_v9 = vld [vmem:[%s3822_s15 + $0x500] sm:$0xf] }
  0x5f   : > { %2957 = vst [vmem:[%s3827_s16 + $0x26c] sm:$0xf] %v2956_v7  ;;  %2959 = vst [vmem:[%s3827_s16 + $0x278] sm:$0xf] %v2958_v8  ;;  %v2962_v10 = vld [vmem:[%s3822_s15 + $0x518] sm:$0xf] }
  0x60   : > { %2961 = vst [vmem:[%s3827_s16 + $0x284] sm:$0xf] %v2960_v9  ;;  %v2964_v11 = vld [vmem:[%s3822_s15 + $0x530] sm:$0xf]  ;;  %v2966_v12 = vld [vmem:[%s3822_s15 + $0x548] sm:$0xf] }
  0x61   : > { %2963 = vst [vmem:[%s3827_s16 + $0x290] sm:$0xf] %v2962_v10  ;;  %2965 = vst [vmem:[%s3827_s16 + $0x29c] sm:$0xf] %v2964_v11  ;;  %v2968_v13 = vld [vmem:[%s3822_s15 + $0x560] sm:$0xf] }
  0x62   : > { %2967 = vst [vmem:[%s3827_s16 + $0x2a8] sm:$0xf] %v2966_v12  ;;  %v2970_v14 = vld [vmem:[%s3822_s15 + $0x578] sm:$0xf]  ;;  %v2972_v15 = vld [vmem:[%s3822_s15 + $0x590] sm:$0xf] }
  0x63   : > { %2969 = vst [vmem:[%s3827_s16 + $0x2b4] sm:$0xf] %v2968_v13  ;;  %2971 = vst [vmem:[%s3827_s16 + $0x2c0] sm:$0xf] %v2970_v14  ;;  %v2974_v16 = vld [vmem:[%s3822_s15 + $0x5a8] sm:$0xf] }
  0x64   : > { %2973 = vst [vmem:[%s3827_s16 + $0x2cc] sm:$0xf] %v2972_v15  ;;  %v2976_v17 = vld [vmem:[%s3822_s15 + $0x5c0] sm:$0xf]  ;;  %v2978_v18 = vld [vmem:[%s3822_s15 + $0x5d8] sm:$0xf] }
  0x65   : > { %2975 = vst [vmem:[%s3827_s16 + $0x2d8] sm:$0xf] %v2974_v16  ;;  %2977 = vst [vmem:[%s3827_s16 + $0x2e4] sm:$0xf] %v2976_v17  ;;  %v2980_v19 = vld [vmem:[%s3822_s15 + $0x5f0] sm:$0xf] }
  0x66   : > { %2979 = vst [vmem:[%s3827_s16 + $0x2f0] sm:$0xf] %v2978_v18  ;;  %v2982_v20 = vld [vmem:[%s3822_s15 + $0x608] sm:$0xf]  ;;  %v2984_v21 = vld [vmem:[%s3822_s15 + $0x620] sm:$0xf] }
  0x67   : > { %2981 = vst [vmem:[%s3827_s16 + $0x2fc] sm:$0xf] %v2980_v19  ;;  %2983 = vst [vmem:[%s3827_s16 + $0x308] sm:$0xf] %v2982_v20  ;;  %v2986_v22 = vld [vmem:[%s3822_s15 + $0x638] sm:$0xf] }
  0x68   : > { %2985 = vst [vmem:[%s3827_s16 + $0x314] sm:$0xf] %v2984_v21  ;;  %v2988_v23 = vld [vmem:[%s3822_s15 + $0x650] sm:$0xf]  ;;  %v2990_v24 = vld [vmem:[%s3822_s15 + $0x668] sm:$0xf] }
  0x69   : > { %2987 = vst [vmem:[%s3827_s16 + $0x320] sm:$0xf] %v2986_v22  ;;  %2989 = vst [vmem:[%s3827_s16 + $0x32c] sm:$0xf] %v2988_v23  ;;  %v2992_v25 = vld [vmem:[%s3822_s15 + $0x680] sm:$0xf] }
  0x6a   : > { %2991 = vst [vmem:[%s3827_s16 + $0x338] sm:$0xf] %v2990_v24  ;;  %v2994_v26 = vld [vmem:[%s3822_s15 + $0x698] sm:$0xf]  ;;  %v2996_v27 = vld [vmem:[%s3822_s15 + $0x6b0] sm:$0xf] }
  0x6b   : > { %2993 = vst [vmem:[%s3827_s16 + $0x344] sm:$0xf] %v2992_v25  ;;  %2995 = vst [vmem:[%s3827_s16 + $0x350] sm:$0xf] %v2994_v26  ;;  %v2998_v28 = vld [vmem:[%s3822_s15 + $0x6c8] sm:$0xf] }
  0x6c   : > { %2997 = vst [vmem:[%s3827_s16 + $0x35c] sm:$0xf] %v2996_v27  ;;  %v3000_v29 = vld [vmem:[%s3822_s15 + $0x6e0] sm:$0xf]  ;;  %v3002_v30 = vld [vmem:[%s3822_s15 + $0x6f8] sm:$0xf] }
  0x6d   : > { %2999 = vst [vmem:[%s3827_s16 + $0x368] sm:$0xf] %v2998_v28  ;;  %3001 = vst [vmem:[%s3827_s16 + $0x374] sm:$0xf] %v3000_v29  ;;  %v3004_v31 = vld [vmem:[%s3822_s15 + $0x710] sm:$0xf] }
  0x6e   : > { %3003 = vst [vmem:[%s3827_s16 + $0x380] sm:$0xf] %v3002_v30  ;;  %v3006_v32 = vld [vmem:[%s3822_s15 + $0x728] sm:$0xf]  ;;  %v3008_v33 = vld [vmem:[%s3822_s15 + $0x740] sm:$0xf] }
  0x6f   : > { %3005 = vst [vmem:[%s3827_s16 + $0x38c] sm:$0xf] %v3004_v31  ;;  %3007 = vst [vmem:[%s3827_s16 + $0x398] sm:$0xf] %v3006_v32  ;;  %v3010_v34 = vld [vmem:[%s3822_s15 + $0x758] sm:$0xf] }
  0x70   : > { %3009 = vst [vmem:[%s3827_s16 + $0x3a4] sm:$0xf] %v3008_v33  ;;  %v3012_v35 = vld [vmem:[%s3822_s15 + $0x770] sm:$0xf]  ;;  %v3014_v36 = vld [vmem:[%s3822_s15 + $0x788] sm:$0xf] }
  0x71   : > { %3011 = vst [vmem:[%s3827_s16 + $0x3b0] sm:$0xf] %v3010_v34  ;;  %3013 = vst [vmem:[%s3827_s16 + $0x3bc] sm:$0xf] %v3012_v35  ;;  %v3016_v37 = vld [vmem:[%s3822_s15 + $0x7a0] sm:$0xf] }
  0x72   : > { %3015 = vst [vmem:[%s3827_s16 + $0x3c8] sm:$0xf] %v3014_v36  ;;  %v3018_v38 = vld [vmem:[%s3822_s15 + $0x7b8] sm:$0xf]  ;;  %v3020_v39 = vld [vmem:[%s3822_s15 + $0x7d0] sm:$0xf] }
  0x73   : > { %3017 = vst [vmem:[%s3827_s16 + $0x3d4] sm:$0xf] %v3016_v37  ;;  %3019 = vst [vmem:[%s3827_s16 + $0x3e0] sm:$0xf] %v3018_v38 }
  0x74   : > { %3021 = vst [vmem:[%s3827_s16 + $0x3ec] sm:$0xf] %v3020_v39 }
  0x75 PF: > { %618 = sbr.rel (!%p3810_p3) target bundleno = 125 (0x7d), region = 58  ;;  %s620_s17 = sand.u32 (%p3810_p3), 1, %s3730_s25  }
  0x76   : > { %s3323_s18 = smul.u32 (%p3810_p3), 12, %s3734_s26 }
  0x77   : > { %s3479_s19 = smul.u32 (%p3810_p3), 36, %s620_s17 }
  0x78   : > { %s625_s22 = scalar_lea.vmem (%p3810_p3), %s4711_s4, %s3323_s18 }
  0x79   : > { %v640_v40 = vld [vmem:[%s625_s22] sm:$0xff] (%p3810_p3)  ;;  %v642_v41 = vld [vmem:[%s625_s22 + $0x18] sm:$0xff] (%p3810_p3)  ;;  %v644_v42 = vld [vmem:[%s625_s22 + $0x30] sm:$0xff] (%p3810_p3)  ;;  %s622_s23 = scalar_lea.vmem (%p3810_p3), [#allocation3], %s3479_s19 }
  0x7a   : > { %641 = vst [vmem:[%s622_s23] sm:$0xff] (%p3810_p3), %v640_v40  ;;  %643 = vst [vmem:[%s622_s23 + $0xc] sm:$0xff] (%p3810_p3), %v642_v41  ;;  %v3023_v43 = vld [vmem:[%s625_s22 + $0x8] sm:$0xf] (%p3810_p3)  ;;  %v3025_v44 = vld [vmem:[%s625_s22 + $0x20] sm:$0xf] (%p3810_p3) }
  0x7b   : > { %645 = vst [vmem:[%s622_s23 + $0x18] sm:$0xff] (%p3810_p3), %v644_v42  ;;  %v3027_v45 = vld [vmem:[%s625_s22 + $0x38] sm:$0xf] (%p3810_p3)  ;;  %3024 = vst [vmem:[%s622_s23 + $0x8] sm:$0xf] (%p3810_p3), %v3023_v43 }
  0x7c   : > { %3026 = vst [vmem:[%s622_s23 + $0x14] sm:$0xf] %v3025_v44  ;;  %3028 = vst [vmem:[%s622_s23 + $0x20] sm:$0xf] %v3027_v45 }
  0x7d PF: > { %p3029_p5 = scmp.ge.s32.totalorder %s3734_s26, 1  ;;  %p672_p6 = scmp.lt.s32.totalorder %s3734_s26, 3 }
  0x7f   : > { %p673_p7 = pnand %p3029_p5, %p672_p6 }
  0x81   : > { %676 = sbr.rel (%p673_p7) target bundleno = 826 (0x33a), region = 88 }
  0x88   : > { %s679_s29 = sand.u32 1, %s3726_s24   ;;  %v3518_v46 = vld [vmem:[%s4708_s1] sm:$0xff]   ;;  %v3736_v47 = vmov 0   ;;  %vm807_vm0 = vcmask 195584   ;;  %v3737_v48 = vmov 1966171168   ;;  %v991_v50 = vlaneseq }
  0x89   : > { %s3480_s10 = smul.u32 1008, %s679_s29  ;;  %856 = vmatprep.mubr.bf16.mxu0 %v3736_v47  ;;  %3416 = vmatprep.mubr.msk.bf16.mxu1 %vm807_vm0, %v3518_v46  ;;  %v989_v49 = vunpack.c.l.s4 %v3737_v48  ;;  %vm814_vm1 = vcmask 1043456   ;;  %v4182_v53 = vld.sshfl [vmem:[%s4707_s0] sm:$0x11 pattern:$0x75316420] }
  0x8a   : > { %s3481_s11 = smul.u32 36, %s679_s29  ;;  %v4184_v57 = vshrl.u32 %v991_v50, 7  ;;  %v987_v0 = vcombine.high %v4182_v53, %v4182_v53  ;;  %v3522_v3 = vld [vmem:[%s4708_s1 + $0x8] sm:$0xff]   ;;  %vm1227_vm2 = vcmask 785408   ;;  %vm3739_vm3 = vmmov 0   ;;  %p756_p10 = scmp.lt.s32.totalorder %s3796_s27, 1 }
  0x8b   : > { %s4177_s26 = scalar_lea.vmem [#allocation2], %s3480_s10  ;;  %v990_v56 = vunpack.c.0.s8 %v989_v49  ;;  %s744_s16 = smul.u32 48, %s3796_s27  ;;  %vm2432_vm4 = vcmask 189440  }
  0x8c   : > { %s688_s12 = scalar_lea.vmem [#allocation3], %s3481_s11  ;;  %v3521_v63 = vld [vmem:[%s4177_s26 + $0x4] ss:$12 sps:$4 sm:$0xff]   ;;  %v3519_v2 = vld [vmem:[%s4177_s26] ss:$12 sps:$4 sm:$0xff]   ;;  %s737_s21 = smul.u32 3, %s3796_s27 }
  0x8d   : > { %v3511_v51 = vld [vmem:[%s688_s12 + $0x4] ss:$12 sps:$4 sm:$0xff]   ;;  %v3513_v52 = vld [vmem:[%s688_s12 + $0x8] ss:$12 sps:$4 sm:$0xff]   ;;  %v3514_v54 = vld [vmem:[%s688_s12] ss:$12 sps:$4 sm:$0xff]   ;;  %v4194_v1 = vsub.s32 %v990_v56, %v4184_v57 }
  0x8e   : > { %824 = vmatprep.subr.bf16.mxu0 %v3511_v51  ;;  %v771_v55 = vld [vmem:[%s688_s12 + $0x18] sm:$0xff]  ;;  %3412 = vmatprep.subr.bf16.mxu1 %v3513_v52  ;;  %v3516_v59 = vld [vmem:[%s688_s12 + $0x20] ss:$0 sps:$4 sm:$0xff]   ;;  %p745_p8 = scmp.lt.s32.totalorder %s744_s16, 95  ;;  %p738_p9 = scmp.lt.s32.totalorder %s737_s21, 5 }
  0x8f   : > { %v3040_v58 = vcombine.high %v771_v55, %v771_v55  ;;  %v3039_v60 = vcombine.low %v771_v55, %v771_v55  ;;  %825 = vmatpush1.bf16.msra.mxu0 %v3514_v54  ;;  %3413 = vmatpush3.bf16.msra.mxu1 %v3513_v52  ;;  %v822_v62 = vsel %vm814_vm1, %v3516_v59, 0  ;;  %v3523_v4 = vld [vmem:[%s4177_s26 + $0x8] ss:$12 sps:$4 sm:$0xff]   ;;  %v4204_v6 = vrot.slane %v987_v0, %v4194_v1  ;;  %v3524_v7 = vld [vmem:[%s4177_s26 + $0x18] ss:$12 sps:$4 sm:$0xff]   ;;  %s4758_s27 = smov (!%p756_p10, %s3796_s27), 1 }
  0x90   : > { %3477 = vmatprep.subr.msk.bf16.mxu1 %vm814_vm1, %v3516_v59  ;;  %v3526_v5 = vld [vmem:[%s4177_s26 + $0x1c] ss:$12 sps:$4 sm:$0xff]   ;;  %v3527_v8 = vld [vmem:[%s4177_s26 + $0x20] ss:$12 sps:$4 sm:$0xff]   ;;  %v3531_v11 = vld [vmem:[%s4177_s26 + $0x38] ss:$12 sps:$4 sm:$0xff]  }
  0x91   : > { %3042 = vmatprep.subr.msk.bf16.mxu0 %vm814_vm1, %v3040_v58  ;;  %v816_v61 = vsel %vm814_vm1, %v3039_v60, 0  ;;  %v3530_v9 = vld [vmem:[%s4177_s26 + $0x34] ss:$12 sps:$4 sm:$0xff]   ;;  %v3528_v10 = vld [vmem:[%s4177_s26 + $0x30] ss:$12 sps:$4 sm:$0xff]   ;;  %s4754_s16 = smov (!%p745_p8, %s744_s16), 95 }
  0x92   : > { %v3534_v12 = vld [vmem:[%s4177_s26 + $0x4c] ss:$12 sps:$4 sm:$0xff]   ;;  %v3532_v13 = vld [vmem:[%s4177_s26 + $0x48] ss:$12 sps:$4 sm:$0xff]   ;;  %v3535_v14 = vld [vmem:[%s4177_s26 + $0x50] ss:$12 sps:$4 sm:$0xff]  }
  0x93   : > { %827 = vmatpush1.bf16.msra.mxu0 %v816_v61  ;;  %3415 = vmatpush3.bf16.msra.mxu1 %v822_v62  ;;  %v3538_v15 = vld [vmem:[%s4177_s26 + $0x64] ss:$12 sps:$4 sm:$0xff]   ;;  %v3536_v16 = vld [vmem:[%s4177_s26 + $0x60] ss:$12 sps:$4 sm:$0xff]   ;;  %v3539_v17 = vld [vmem:[%s4177_s26 + $0x68] ss:$12 sps:$4 sm:$0xff]  }
  0x94   : > { %1231 = vmatprep.subr.bf16.mxu0 %v3521_v63  ;;  %1272 = vmatprep.subr.bf16.mxu1 %v3736_v47  ;;  %v3542_v18 = vld [vmem:[%s4177_s26 + $0x7c] ss:$12 sps:$4 sm:$0xff]   ;;  %v3540_v19 = vld [vmem:[%s4177_s26 + $0x78] ss:$12 sps:$4 sm:$0xff]   ;;  %v3543_v20 = vld [vmem:[%s4177_s26 + $0x80] ss:$12 sps:$4 sm:$0xff]  }
  0x95   : > { %v3546_v21 = vld [vmem:[%s4177_s26 + $0x94] ss:$12 sps:$4 sm:$0xff]   ;;  %v3544_v22 = vld [vmem:[%s4177_s26 + $0x90] ss:$12 sps:$4 sm:$0xff]   ;;  %v3547_v23 = vld [vmem:[%s4177_s26 + $0x98] ss:$12 sps:$4 sm:$0xff]  }
  0x96   : > { %3043 = vmatmul.mubr.msk.bf16.vlgmr.msra.gmra.mrb[0].mxu0 %vm807_vm0, %v3518_v46  ;;  %3417 = vmatmul.mubr.msk.bf16.vlgmr.msra.gmra.mrb[0].mxu1 %vm807_vm0, %v3522_v3  ;;  %v3550_v24 = vld [vmem:[%s4177_s26 + $0xac] ss:$12 sps:$4 sm:$0xff]   ;;  %v3548_v25 = vld [vmem:[%s4177_s26 + $0xa8] ss:$12 sps:$4 sm:$0xff]   ;;  %v3551_v26 = vld [vmem:[%s4177_s26 + $0xb0] ss:$12 sps:$4 sm:$0xff]   ;;  %v4268_v46 = vrot.slane %v4182_v53, %v4194_v1 }
  0x97   : > { %1232 = vmatpush1.bf16.msra.mxu0 %v3519_v2  ;;  %1273 = vmatpush1.bf16.msra.mxu1 %v3523_v4  ;;  %v3554_v27 = vld [vmem:[%s4177_s26 + $0xc4] ss:$12 sps:$4 sm:$0xff]   ;;  %v3552_v28 = vld [vmem:[%s4177_s26 + $0xc0] ss:$12 sps:$4 sm:$0xff]   ;;  %v3555_v29 = vld [vmem:[%s4177_s26 + $0xc8] ss:$12 sps:$4 sm:$0xff]  }
  0x98   : > { %1233 = vmatprep.subr.bf16.mxu0 %v3526_v5  ;;  %1274 = vmatprep.subr.bf16.mxu1 %v3736_v47  ;;  %v3558_v30 = vld [vmem:[%s4177_s26 + $0xdc] ss:$12 sps:$4 sm:$0xff]   ;;  %v3556_v31 = vld [vmem:[%s4177_s26 + $0xd8] ss:$12 sps:$4 sm:$0xff]   ;;  %v3559_v32 = vld [vmem:[%s4177_s26 + $0xe0] ss:$12 sps:$4 sm:$0xff]  }
  0x99   : > { %866 = vmatprep.mubr.bf16.mxu0 %v3736_v47  ;;  %3091 = vmatprep.mubr.msk.bf16.mxu1 %vm1227_vm2, %v4204_v6  ;;  %v3562_v33 = vld [vmem:[%s4177_s26 + $0xf4] ss:$12 sps:$4 sm:$0xff]   ;;  %v3560_v34 = vld [vmem:[%s4177_s26 + $0xf0] ss:$12 sps:$4 sm:$0xff]   ;;  %v3563_v35 = vld [vmem:[%s4177_s26 + $0xf8] ss:$12 sps:$4 sm:$0xff]  }
  0x9a   : > { %v3566_v36 = vld [vmem:[%s4177_s26 + $0x10c] ss:$12 sps:$4 sm:$0xff]   ;;  %v3564_v37 = vld [vmem:[%s4177_s26 + $0x108] ss:$12 sps:$4 sm:$0xff]   ;;  %v3567_v38 = vld [vmem:[%s4177_s26 + $0x110] ss:$12 sps:$4 sm:$0xff]  }
  0x9b   : > { %1234 = vmatpush1.bf16.msra.mxu0 %v3524_v7  ;;  %1275 = vmatpush1.bf16.msra.mxu1 %v3527_v8  ;;  %v3570_v39 = vld [vmem:[%s4177_s26 + $0x124] ss:$12 sps:$4 sm:$0xff]   ;;  %v3568_v40 = vld [vmem:[%s4177_s26 + $0x120] ss:$12 sps:$4 sm:$0xff]   ;;  %v3571_v41 = vld [vmem:[%s4177_s26 + $0x128] ss:$12 sps:$4 sm:$0xff]  }
  0x9c   : > { %1235 = vmatprep.subr.bf16.mxu0 %v3530_v9  ;;  %1276 = vmatprep.subr.bf16.mxu1 %v3736_v47  ;;  %v3574_v42 = vld [vmem:[%s4177_s26 + $0x13c] ss:$12 sps:$4 sm:$0xff]   ;;  %v3572_v43 = vld [vmem:[%s4177_s26 + $0x138] ss:$12 sps:$4 sm:$0xff]   ;;  %v3575_v44 = vld [vmem:[%s4177_s26 + $0x140] ss:$12 sps:$4 sm:$0xff]  }
  0x9d   : > { %v3578_v45 = vld [vmem:[%s4177_s26 + $0x154] ss:$12 sps:$4 sm:$0xff]   ;;  %v3576_v48 = vld [vmem:[%s4177_s26 + $0x150] ss:$12 sps:$4 sm:$0xff]   ;;  %v3579_v49 = vld [vmem:[%s4177_s26 + $0x158] ss:$12 sps:$4 sm:$0xff]  }
  0x9e   : > { %3044 = vmatmul.mubr.msk.bf16.gmra.mrb[4].mxu0 %vm807_vm0, %v3522_v3  ;;  %v3582_v50 = vld [vmem:[%s4177_s26 + $0x16c] ss:$12 sps:$4 sm:$0xff]   ;;  %v3580_v51 = vld [vmem:[%s4177_s26 + $0x168] ss:$12 sps:$4 sm:$0xff]   ;;  %v3583_v52 = vld [vmem:[%s4177_s26 + $0x170] ss:$12 sps:$4 sm:$0xff]  }
  0x9f   : > { %1236 = vmatpush1.bf16.msra.mxu0 %v3528_v10  ;;  %1277 = vmatpush1.bf16.msra.mxu1 %v3531_v11  ;;  %v3586_v53 = vld [vmem:[%s4177_s26 + $0x184] ss:$12 sps:$4 sm:$0xff]   ;;  %v3584_v54 = vld [vmem:[%s4177_s26 + $0x180] ss:$12 sps:$4 sm:$0xff]   ;;  %v3587_v55 = vld [vmem:[%s4177_s26 + $0x188] ss:$12 sps:$4 sm:$0xff]  }
  0xa0   : > { %1237 = vmatprep.subr.bf16.mxu0 %v3534_v12  ;;  %1278 = vmatprep.subr.bf16.mxu1 %v3736_v47  ;;  %v3590_v56 = vld [vmem:[%s4177_s26 + $0x19c] ss:$12 sps:$4 sm:$0xff]   ;;  %v3588_v58 = vld [vmem:[%s4177_s26 + $0x198] ss:$12 sps:$4 sm:$0xff]   ;;  %v3591_v59 = vld [vmem:[%s4177_s26 + $0x1a0] ss:$12 sps:$4 sm:$0xff]  }
  0xa1   : > { %3090 = vmatprep.mubr.msk.bf16.mxu0 %vm1227_vm2, %v4204_v6  ;;  %v3594_v60 = vld [vmem:[%s4177_s26 + $0x1b4] ss:$12 sps:$4 sm:$0xff]   ;;  %v3592_v61 = vld [vmem:[%s4177_s26 + $0x1b0] ss:$12 sps:$4 sm:$0xff]   ;;  %v3595_v62 = vld [vmem:[%s4177_s26 + $0x1b8] ss:$12 sps:$4 sm:$0xff]  }
  0xa2   : > { %v3598_v63 = vld [vmem:[%s4177_s26 + $0x1cc] ss:$12 sps:$4 sm:$0xff]   ;;  %v3596_v0 = vld [vmem:[%s4177_s26 + $0x1c8] ss:$12 sps:$4 sm:$0xff]   ;;  %v3599_v1 = vld [vmem:[%s4177_s26 + $0x1d0] ss:$12 sps:$4 sm:$0xff]  }
  0xa3   : > { %1238 = vmatpush1.bf16.msra.mxu0 %v3532_v13  ;;  %1279 = vmatpush1.bf16.msra.mxu1 %v3535_v14  ;;  %v3602_v2 = vld [vmem:[%s4177_s26 + $0x1e4] ss:$12 sps:$4 sm:$0xff]   ;;  %v3600_v3 = vld [vmem:[%s4177_s26 + $0x1e0] ss:$12 sps:$4 sm:$0xff]   ;;  %v3603_v4 = vld [vmem:[%s4177_s26 + $0x1e8] ss:$12 sps:$4 sm:$0xff]  }
  0xa4   : > { %1239 = vmatprep.subr.bf16.mxu0 %v3538_v15  ;;  %1280 = vmatprep.subr.bf16.mxu1 %v3736_v47  ;;  %v3606_v5 = vld [vmem:[%s4177_s26 + $0x1fc] ss:$12 sps:$4 sm:$0xff]   ;;  %v3604_v7 = vld [vmem:[%s4177_s26 + $0x1f8] ss:$12 sps:$4 sm:$0xff]   ;;  %v3607_v8 = vld [vmem:[%s4177_s26 + $0x200] ss:$12 sps:$4 sm:$0xff]  }
  0xa5   : > { %v3610_v9 = vld [vmem:[%s4177_s26 + $0x214] ss:$12 sps:$4 sm:$0xff]   ;;  %v3608_v10 = vld [vmem:[%s4177_s26 + $0x210] ss:$12 sps:$4 sm:$0xff]   ;;  %v3611_v11 = vld [vmem:[%s4177_s26 + $0x218] ss:$12 sps:$4 sm:$0xff]  }
  0xa6   : > { %v3614_v12 = vld [vmem:[%s4177_s26 + $0x22c] ss:$12 sps:$4 sm:$0xff]   ;;  %v3612_v13 = vld [vmem:[%s4177_s26 + $0x228] ss:$12 sps:$4 sm:$0xff]   ;;  %v3615_v14 = vld [vmem:[%s4177_s26 + $0x230] ss:$12 sps:$4 sm:$0xff]  }
  0xa7   : > { %1240 = vmatpush1.bf16.msra.mxu0 %v3536_v16  ;;  %1281 = vmatpush1.bf16.msra.mxu1 %v3539_v17  ;;  %v3618_v15 = vld [vmem:[%s4177_s26 + $0x244] ss:$12 sps:$4 sm:$0xff]   ;;  %v3616_v16 = vld [vmem:[%s4177_s26 + $0x240] ss:$12 sps:$4 sm:$0xff]   ;;  %v3619_v17 = vld [vmem:[%s4177_s26 + $0x248] ss:$12 sps:$4 sm:$0xff]  }
  0xa8   : > { %1241 = vmatprep.subr.bf16.mxu0 %v3542_v18  ;;  %1282 = vmatprep.subr.bf16.mxu1 %v3736_v47  ;;  %v3622_v18 = vld [vmem:[%s4177_s26 + $0x25c] ss:$12 sps:$4 sm:$0xff]   ;;  %s3031_s17 = sshll.u32 %s4754_s16, 2  ;;  %s4756_s21 = smov (!%p738_p9, %s737_s21), 5 }
  0xa9   : > { %s4414_s20 = scalar_lea.vmem %s4712_s5, %s3031_s17  ;;  %s3030_s22 = sshll.u32 %s4756_s21, 2 }
  0xaa   : > { %s4504_s30 = scalar_lea.vmem %s4710_s3, %s3030_s22  ;;  %s3032_s9 = sshll.u32 %s4756_s21, 3 }
  0xab   : > { %1242 = vmatpush1.bf16.msra.mxu0 %v3540_v19  ;;  %1283 = vmatpush1.bf16.msra.mxu1 %v3543_v20  ;;  %v3620_v19 = vld [vmem:[%s4177_s26 + $0x258] ss:$12 sps:$4 sm:$0xff]   ;;  %v3623_v20 = vld [vmem:[%s4177_s26 + $0x260] ss:$12 sps:$4 sm:$0xff]   ;;  %s3482_s12 = smul.u32 6, %s4758_s27 }
  0xac   : > { %1243 = vmatprep.subr.bf16.mxu0 %v3546_v21  ;;  %1284 = vmatprep.subr.bf16.mxu1 %v3736_v47  ;;  %v3626_v21 = vld [vmem:[%s4177_s26 + $0x274] ss:$12 sps:$4 sm:$0xff]  }
  0xad   : > { %s760_s14 = scalar_lea.vmem %s4714_s7, %s3482_s12 }
  0xaf   : > { %1244 = vmatpush1.bf16.msra.mxu0 %v3544_v22  ;;  %1285 = vmatpush1.bf16.msra.mxu1 %v3547_v23  ;;  %v3624_v22 = vld [vmem:[%s4177_s26 + $0x270] ss:$12 sps:$4 sm:$0xff]   ;;  %v3627_v23 = vld [vmem:[%s4177_s26 + $0x278] ss:$12 sps:$4 sm:$0xff]  }
  0xb0   : > { %1245 = vmatprep.subr.bf16.mxu0 %v3550_v24  ;;  %1286 = vmatprep.subr.bf16.mxu1 %v3736_v47  ;;  %v3630_v24 = vld [vmem:[%s4177_s26 + $0x28c] ss:$12 sps:$4 sm:$0xff]  }
  0xb3   : > { %1246 = vmatpush1.bf16.msra.mxu0 %v3548_v25  ;;  %1287 = vmatpush1.bf16.msra.mxu1 %v3551_v26  ;;  %v3628_v25 = vld [vmem:[%s4177_s26 + $0x288] ss:$12 sps:$4 sm:$0xff]   ;;  %v3631_v26 = vld [vmem:[%s4177_s26 + $0x290] ss:$12 sps:$4 sm:$0xff]  }
  0xb4   : > { %1247 = vmatprep.subr.bf16.mxu0 %v3554_v27  ;;  %1288 = vmatprep.subr.bf16.mxu1 %v3736_v47  ;;  %v3634_v27 = vld [vmem:[%s4177_s26 + $0x2a4] ss:$12 sps:$4 sm:$0xff]  }
  0xb7   : > { %1248 = vmatpush1.bf16.msra.mxu0 %v3552_v28  ;;  %1289 = vmatpush1.bf16.msra.mxu1 %v3555_v29  ;;  %v3632_v28 = vld [vmem:[%s4177_s26 + $0x2a0] ss:$12 sps:$4 sm:$0xff]   ;;  %v3635_v29 = vld [vmem:[%s4177_s26 + $0x2a8] ss:$12 sps:$4 sm:$0xff]  }
  0xb8   : > { %1249 = vmatprep.subr.bf16.mxu0 %v3558_v30  ;;  %1290 = vmatprep.subr.bf16.mxu1 %v3736_v47  ;;  %v3638_v30 = vld [vmem:[%s4177_s26 + $0x2bc] ss:$12 sps:$4 sm:$0xff]  }
  0xbb   : > { %1250 = vmatpush1.bf16.msra.mxu0 %v3556_v31  ;;  %1291 = vmatpush1.bf16.msra.mxu1 %v3559_v32  ;;  %v3636_v31 = vld [vmem:[%s4177_s26 + $0x2b8] ss:$12 sps:$4 sm:$0xff]   ;;  %v3639_v32 = vld [vmem:[%s4177_s26 + $0x2c0] ss:$12 sps:$4 sm:$0xff]  }
  0xbc   : > { %1251 = vmatprep.subr.bf16.mxu0 %v3562_v33  ;;  %1292 = vmatprep.subr.bf16.mxu1 %v3736_v47  ;;  %v3642_v33 = vld [vmem:[%s4177_s26 + $0x2d4] ss:$12 sps:$4 sm:$0xff]  }
  0xbf   : > { %1252 = vmatpush1.bf16.msra.mxu0 %v3560_v34  ;;  %1293 = vmatpush1.bf16.msra.mxu1 %v3563_v35  ;;  %v3640_v34 = vld [vmem:[%s4177_s26 + $0x2d0] ss:$12 sps:$4 sm:$0xff]   ;;  %v3643_v35 = vld [vmem:[%s4177_s26 + $0x2d8] ss:$12 sps:$4 sm:$0xff]  }
  0xc0   : > { %1253 = vmatprep.subr.bf16.mxu0 %v3566_v36  ;;  %1294 = vmatprep.subr.bf16.mxu1 %v3736_v47  ;;  %v3646_v36 = vld [vmem:[%s4177_s26 + $0x2ec] ss:$12 sps:$4 sm:$0xff]  }
  0xc3   : > { %1254 = vmatpush1.bf16.msra.mxu0 %v3564_v37  ;;  %1295 = vmatpush1.bf16.msra.mxu1 %v3567_v38  ;;  %v3644_v37 = vld [vmem:[%s4177_s26 + $0x2e8] ss:$12 sps:$4 sm:$0xff]   ;;  %v3647_v38 = vld [vmem:[%s4177_s26 + $0x2f0] ss:$12 sps:$4 sm:$0xff]  }
  0xc4   : > { %1255 = vmatprep.subr.bf16.mxu0 %v3570_v39  ;;  %1296 = vmatprep.subr.bf16.mxu1 %v3736_v47  ;;  %v3648_v39 = vld [vmem:[%s4177_s26 + $0x300] ss:$12 sps:$4 sm:$0xff]  }
  0xc7   : > { %1256 = vmatpush1.bf16.msra.mxu0 %v3568_v40  ;;  %1297 = vmatpush1.bf16.msra.mxu1 %v3571_v41  ;;  %v3651_v40 = vld [vmem:[%s4177_s26 + $0x308] ss:$12 sps:$4 sm:$0xff]  }
  0xc8   : > { %1257 = vmatprep.subr.bf16.mxu0 %v3574_v42  ;;  %1298 = vmatprep.subr.bf16.mxu1 %v3736_v47  ;;  %v3654_v41 = vld [vmem:[%s4177_s26 + $0x31c] ss:$12 sps:$4 sm:$0xff]   ;;  %v3652_v42 = vld [vmem:[%s4177_s26 + $0x318] ss:$12 sps:$4 sm:$0xff]  }
  0xcb   : > { %1258 = vmatpush1.bf16.msra.mxu0 %v3572_v43  ;;  %1299 = vmatpush1.bf16.msra.mxu1 %v3575_v44  ;;  %v3655_v43 = vld [vmem:[%s4177_s26 + $0x320] ss:$12 sps:$4 sm:$0xff]  }
  0xcc   : > { %1613 = vmatprep.subr.bf16.mxu0 %v3578_v45  ;;  %1654 = vmatprep.subr.bf16.mxu1 %v3736_v47  ;;  %v3658_v44 = vld [vmem:[%s4177_s26 + $0x334] ss:$12 sps:$4 sm:$0xff]   ;;  %v3656_v45 = vld [vmem:[%s4177_s26 + $0x330] ss:$12 sps:$4 sm:$0xff]  }
  0xce   : > { %1264 = vmatmul.mubr.bf16.vlgmr.msra.gmra.mrb[8].mxu0 %v4268_v46  ;;  %1305 = vmatmul.mubr.bf16.vlgmr.msra.gmra.mrb[4].mxu1 %v4268_v46 }
  0xcf   : > { %1614 = vmatpush1.bf16.msra.mxu0 %v3576_v48  ;;  %1655 = vmatpush1.bf16.msra.mxu1 %v3579_v49  ;;  %v3659_v48 = vld [vmem:[%s4177_s26 + $0x338] ss:$12 sps:$4 sm:$0xff]  }
  0xd0   : > { %1615 = vmatprep.subr.bf16.mxu0 %v3582_v50  ;;  %1656 = vmatprep.subr.bf16.mxu1 %v3736_v47  ;;  %v3662_v49 = vld [vmem:[%s4177_s26 + $0x34c] ss:$12 sps:$4 sm:$0xff]   ;;  %v3660_v50 = vld [vmem:[%s4177_s26 + $0x348] ss:$12 sps:$4 sm:$0xff]  }
  0xd1   : > { %3190 = vmatprep.mubr.msk.bf16.mxu0 %vm1227_vm2, %v4204_v6  ;;  %3191 = vmatprep.mubr.msk.bf16.mxu1 %vm1227_vm2, %v4204_v6 }
  0xd3   : > { %1616 = vmatpush1.bf16.msra.mxu0 %v3580_v51  ;;  %1657 = vmatpush1.bf16.msra.mxu1 %v3583_v52  ;;  %v3663_v51 = vld [vmem:[%s4177_s26 + $0x350] ss:$12 sps:$4 sm:$0xff]  }
  0xd4   : > { %1617 = vmatprep.subr.bf16.mxu0 %v3586_v53  ;;  %1658 = vmatprep.subr.bf16.mxu1 %v3736_v47  ;;  %v3666_v52 = vld [vmem:[%s4177_s26 + $0x364] ss:$12 sps:$4 sm:$0xff]   ;;  %v3664_v53 = vld [vmem:[%s4177_s26 + $0x360] ss:$12 sps:$4 sm:$0xff]  }
  0xd7   : > { %1618 = vmatpush1.bf16.msra.mxu0 %v3584_v54  ;;  %1659 = vmatpush1.bf16.msra.mxu1 %v3587_v55  ;;  %v3667_v54 = vld [vmem:[%s4177_s26 + $0x368] ss:$12 sps:$4 sm:$0xff]  }
  0xd8   : > { %1619 = vmatprep.subr.bf16.mxu0 %v3590_v56  ;;  %1660 = vmatprep.subr.bf16.mxu1 %v3736_v47  ;;  %v3670_v55 = vld [vmem:[%s4177_s26 + $0x37c] ss:$12 sps:$4 sm:$0xff]   ;;  %v3668_v56 = vld [vmem:[%s4177_s26 + $0x378] ss:$12 sps:$4 sm:$0xff]  }
  0xdb   : > { %1620 = vmatpush1.bf16.msra.mxu0 %v3588_v58  ;;  %1661 = vmatpush1.bf16.msra.mxu1 %v3591_v59  ;;  %v3671_v58 = vld [vmem:[%s4177_s26 + $0x380] ss:$12 sps:$4 sm:$0xff]  }
  0xdc   : > { %1621 = vmatprep.subr.bf16.mxu0 %v3594_v60  ;;  %1662 = vmatprep.subr.bf16.mxu1 %v3736_v47  ;;  %v3674_v59 = vld [vmem:[%s4177_s26 + $0x394] ss:$12 sps:$4 sm:$0xff]   ;;  %v3672_v60 = vld [vmem:[%s4177_s26 + $0x390] ss:$12 sps:$4 sm:$0xff]  }
  0xdf   : > { %1622 = vmatpush1.bf16.msra.mxu0 %v3592_v61  ;;  %1663 = vmatpush1.bf16.msra.mxu1 %v3595_v62  ;;  %v3675_v61 = vld [vmem:[%s4177_s26 + $0x398] ss:$12 sps:$4 sm:$0xff]  }
  0xe0   : > { %1623 = vmatprep.subr.bf16.mxu0 %v3598_v63  ;;  %1664 = vmatprep.subr.bf16.mxu1 %v3736_v47  ;;  %v3678_v62 = vld [vmem:[%s4177_s26 + $0x3ac] ss:$12 sps:$4 sm:$0xff]   ;;  %v3676_v63 = vld [vmem:[%s4177_s26 + $0x3a8] ss:$12 sps:$4 sm:$0xff]  }
  0xe3   : > { %1624 = vmatpush1.bf16.msra.mxu0 %v3596_v0  ;;  %1665 = vmatpush1.bf16.msra.mxu1 %v3599_v1  ;;  %v3679_v0 = vld [vmem:[%s4177_s26 + $0x3b0] ss:$12 sps:$4 sm:$0xff]  }
  0xe4   : > { %1625 = vmatprep.subr.bf16.mxu0 %v3602_v2  ;;  %1666 = vmatprep.subr.bf16.mxu1 %v3736_v47  ;;  %v3682_v1 = vld [vmem:[%s4177_s26 + $0x3c4] ss:$12 sps:$4 sm:$0xff]   ;;  %v3680_v2 = vld [vmem:[%s4177_s26 + $0x3c0] ss:$12 sps:$4 sm:$0xff]  }
  0xe7   : > { %1626 = vmatpush1.bf16.msra.mxu0 %v3600_v3  ;;  %1667 = vmatpush1.bf16.msra.mxu1 %v3603_v4  ;;  %v3683_v3 = vld [vmem:[%s4177_s26 + $0x3c8] ss:$12 sps:$4 sm:$0xff]  }
  0xe8   : > { %1627 = vmatprep.subr.bf16.mxu0 %v3606_v5  ;;  %1668 = vmatprep.subr.bf16.mxu1 %v3736_v47  ;;  %v3686_v4 = vld [vmem:[%s4177_s26 + $0x3dc] ss:$12 sps:$4 sm:$0xff]   ;;  %v3684_v5 = vld [vmem:[%s4177_s26 + $0x3d8] ss:$12 sps:$4 sm:$0xff]  }
  0xeb   : > { %1628 = vmatpush1.bf16.msra.mxu0 %v3604_v7  ;;  %1669 = vmatpush1.bf16.msra.mxu1 %v3607_v8  ;;  %v3687_v7 = vld [vmem:[%s4177_s26 + $0x3e0] ss:$12 sps:$4 sm:$0xff]   ;;  %v4715_v8 = vmov 0.0  }
  0xec   : > { %1629 = vmatprep.subr.bf16.mxu0 %v3610_v9  ;;  %1670 = vmatprep.subr.bf16.mxu1 %v3736_v47 }
  0xef   : > { %1630 = vmatpush1.bf16.msra.mxu0 %v3608_v10  ;;  %1671 = vmatpush1.bf16.msra.mxu1 %v3611_v11 }
  0xf0   : > { %1631 = vmatprep.subr.bf16.mxu0 %v3614_v12  ;;  %1672 = vmatprep.subr.bf16.mxu1 %v3736_v47 }
  0xf3   : > { %1632 = vmatpush1.bf16.msra.mxu0 %v3612_v13  ;;  %1673 = vmatpush1.bf16.msra.mxu1 %v3615_v14 }
  0xf4   : > { %1633 = vmatprep.subr.bf16.mxu0 %v3618_v15  ;;  %1674 = vmatprep.subr.bf16.mxu1 %v3736_v47  ;;  %v4417_v15 = vld [vmem:[%s4414_s20 + $0x80] sm:$0xff]  }
  0xf7   : > { %1634 = vmatpush1.bf16.msra.mxu0 %v3616_v16  ;;  %1675 = vmatpush1.bf16.msra.mxu1 %v3619_v17  ;;  %v4420_v16 = vld [vmem:[%s4414_s20 + $0x40] sm:$0xff]  }
  0xf8   : > { %1635 = vmatprep.subr.bf16.mxu0 %v3622_v18  ;;  %1676 = vmatprep.subr.bf16.mxu1 %v3736_v47  ;;  %4733 = vst [vmem:[#allocation4_spill] sm:$0xff] %v4420_v16  ;;  %v4424_v17 = vld [vmem:[%s4414_s20] sm:$0xff]  }
  0xfb   : > { %1636 = vmatpush1.bf16.msra.mxu0 %v3620_v19  ;;  %1677 = vmatpush1.bf16.msra.mxu1 %v3623_v20  ;;  %v4431_v19 = vld [vmem:[%s4414_s20 + $0x88] sm:$0xff]  }
  0xfc   : > { %1637 = vmatprep.subr.bf16.mxu0 %v3626_v21  ;;  %1678 = vmatprep.subr.bf16.mxu1 %v3736_v47  ;;  %v4437_v21 = vld [vmem:[%s4414_s20 + $0x48] sm:$0xff]  }
  0xff   : > { %1638 = vmatpush1.bf16.msra.mxu0 %v3624_v22  ;;  %1679 = vmatpush1.bf16.msra.mxu1 %v3627_v23  ;;  %v4440_v22 = vld [vmem:[%s4414_s20 + $0x8] sm:$0xff]  }
 0x100   : > { %1639 = vmatprep.subr.bf16.mxu0 %v3630_v24  ;;  %1680 = vmatprep.subr.bf16.mxu1 %v3736_v47 }
 0x103   : > { %1640 = vmatpush1.bf16.msra.mxu0 %v3628_v25  ;;  %1681 = vmatpush1.bf16.msra.mxu1 %v3631_v26  ;;  %v4445_v25 = vld [vmem:[%s4414_s20 + $0x90] sm:$0xff]  }
 0x104   : > { %1996 = vmatprep.subr.bf16.mxu0 %v3634_v27  ;;  %2037 = vmatprep.subr.bf16.mxu1 %v3736_v47  ;;  %v4449_v26 = vld [vmem:[%s4414_s20 + $0x50] sm:$0xff]  }
 0x105   : > { %v4453_v27 = vld [vmem:[%s4414_s20 + $0x10] sm:$0xff]  }
 0x106   : > { %1646 = vmatmul.mubr.bf16.vlgmr.msra.gmra.mrb[12].mxu0 %v4268_v46  ;;  %1687 = vmatmul.mubr.bf16.vlgmr.msra.gmra.mrb[8].mxu1 %v4268_v46 }
 0x107   : > { %1997 = vmatpush1.bf16.msra.mxu0 %v3632_v28  ;;  %2038 = vmatpush1.bf16.msra.mxu1 %v3635_v29  ;;  %v4457_v28 = vld [vmem:[%s4414_s20 + $0x98] sm:$0xff]  }
 0x108   : > { %1998 = vmatprep.subr.bf16.mxu0 %v3638_v30  ;;  %2039 = vmatprep.subr.bf16.mxu1 %v3736_v47  ;;  %v4461_v29 = vld [vmem:[%s4414_s20 + $0x58] sm:$0xff]  }
 0x109   : > { %3291 = vmatprep.mubr.msk.bf16.mxu0 %vm1227_vm2, %v4204_v6  ;;  %3292 = vmatprep.mubr.msk.bf16.mxu1 %vm1227_vm2, %v4204_v6  ;;  %v3650_v6 = vld [vmem:[%s4177_s26 + $0x304] ss:$12 sps:$4 sm:$0xff]   ;;  %v4465_v30 = vld [vmem:[%s4414_s20 + $0x18] sm:$0xff]   ;;  %s4597_s26 = scalar_lea.vmem %s4713_s6, %s3032_s9 }
 0x10b   : > { %1999 = vmatpush1.bf16.msra.mxu0 %v3636_v31  ;;  %2040 = vmatpush1.bf16.msra.mxu1 %v3639_v32  ;;  %v4469_v31 = vld [vmem:[%s4414_s20 + $0xa0] sm:$0xff]  }
 0x10c   : > { %2000 = vmatprep.subr.bf16.mxu0 %v3642_v33  ;;  %2041 = vmatprep.subr.bf16.mxu1 %v3736_v47  ;;  %v4473_v32 = vld [vmem:[%s4414_s20 + $0x60] sm:$0xff]  }
 0x10d   : > { %v4477_v33 = vld [vmem:[%s4414_s20 + $0x20] sm:$0xff]  }
 0x10f   : > { %2001 = vmatpush1.bf16.msra.mxu0 %v3640_v34  ;;  %2042 = vmatpush1.bf16.msra.mxu1 %v3643_v35  ;;  %v4489_v34 = vld [vmem:[%s4414_s20 + $0xa8] sm:$0xff]  }
 0x110   : > { %2002 = vmatprep.subr.bf16.mxu0 %v3646_v36  ;;  %2043 = vmatprep.subr.bf16.mxu1 %v3736_v47  ;;  %v4493_v35 = vld [vmem:[%s4414_s20 + $0x68] sm:$0xff]  }
 0x111   : > { %v4497_v36 = vld [vmem:[%s4414_s20 + $0x28] sm:$0xff]  }
 0x112   : > { %4734 = vst [vmem:[#allocation5_spill] sm:$0xff] %v4497_v36 }
 0x113   : > { %2003 = vmatpush1.bf16.msra.mxu0 %v3644_v37  ;;  %2044 = vmatpush1.bf16.msra.mxu1 %v3647_v38  ;;  %v4508_v37 = vld [vmem:[%s4414_s20 + $0xb0] sm:$0xff]  }
 0x114   : > { %2004 = vmatprep.subr.bf16.mxu0 %v3650_v6  ;;  %2045 = vmatprep.subr.bf16.mxu1 %v3736_v47  ;;  %4735 = vst [vmem:[#allocation6_spill] sm:$0xff] %v4508_v37  ;;  %v4511_v38 = vld [vmem:[%s4414_s20 + $0x70] sm:$0xff]   ;;  %v4514_v6 = vsub.s32 0, %v4184_v57 }
 0x115   : > { %4736 = vst [vmem:[#allocation7_spill] sm:$0xff] %v4511_v38 }
 0x117   : > { %2005 = vmatpush1.bf16.msra.mxu0 %v3648_v39  ;;  %2046 = vmatpush1.bf16.msra.mxu1 %v3651_v40  ;;  %v4517_v39 = vsub.s32 2, %v4184_v57  ;;  %v4521_v40 = vld [vmem:[%s4414_s20 + $0x30] sm:$0xff]  }
 0x118   : > { %2006 = vmatprep.subr.bf16.mxu0 %v3654_v41  ;;  %2047 = vmatprep.subr.bf16.mxu1 %v3736_v47  ;;  %4737 = vst [vmem:[#allocation8_spill] sm:$0xff] %v4521_v40  ;;  %v1312_v41 = vld [vmem:[%s4504_s30] ss:$4 sm:$0x7] }
 0x11b   : > { %2007 = vmatpush1.bf16.msra.mxu0 %v3652_v42  ;;  %2048 = vmatpush1.bf16.msra.mxu1 %v3655_v43  ;;  %v4525_v42 = vsub.s32 1, %v4184_v57  ;;  %v4531_v43 = vld [vmem:[%s4414_s20 + $0xb8] sm:$0xff]  }
 0x11c   : > { %2008 = vmatprep.subr.bf16.mxu0 %v3658_v44  ;;  %2049 = vmatprep.subr.bf16.mxu1 %v3736_v47  ;;  %4738 = vst [vmem:[#allocation9_spill] sm:$0xff] %v4531_v43  ;;  %v4534_v44 = vld [vmem:[%s4414_s20 + $0x78] sm:$0xff]  }
 0x11d   : > { %4739 = vst [vmem:[#allocation10_spill] sm:$0xff] %v4534_v44  ;;  %v1321_v57 = vrot.slane %v1312_v41, %v4525_v42 }
 0x11f   : > { %2009 = vmatpush1.bf16.msra.mxu0 %v3656_v45  ;;  %2050 = vmatpush1.bf16.msra.mxu1 %v3659_v48  ;;  %v4537_v45 = vld [vmem:[%s4414_s20 + $0x38] sm:$0xff]   ;;  %v1317_v48 = vrot.slane %v1312_v41, %v4514_v6 }
 0x120   : > { %2010 = vmatprep.subr.bf16.mxu0 %v3662_v49  ;;  %2051 = vmatprep.subr.bf16.mxu1 %v3736_v47  ;;  %4740 = vst [vmem:[#allocation11_spill] sm:$0xff] %v4537_v45  ;;  %v1325_v49 = vrot.slane %v1312_v41, %v4517_v39 }
 0x123   : > { %2011 = vmatpush1.bf16.msra.mxu0 %v3660_v50  ;;  %2052 = vmatpush1.bf16.msra.mxu1 %v3663_v51 }
 0x124   : > { %2012 = vmatprep.subr.bf16.mxu0 %v3666_v52  ;;  %2053 = vmatprep.subr.bf16.mxu1 %v3736_v47 }
 0x127   : > { %2013 = vmatpush1.bf16.msra.mxu0 %v3664_v53  ;;  %2054 = vmatpush1.bf16.msra.mxu1 %v3667_v54 }
 0x128   : > { %2014 = vmatprep.subr.bf16.mxu0 %v3670_v55  ;;  %2055 = vmatprep.subr.bf16.mxu1 %v3736_v47 }
 0x12b   : > { %2015 = vmatpush1.bf16.msra.mxu0 %v3668_v56  ;;  %2056 = vmatpush1.bf16.msra.mxu1 %v3671_v58 }
 0x12c   : > { %2016 = vmatprep.subr.bf16.mxu0 %v3674_v59  ;;  %2057 = vmatprep.subr.bf16.mxu1 %v3736_v47 }
 0x12f   : > { %2017 = vmatpush1.bf16.msra.mxu0 %v3672_v60  ;;  %2058 = vmatpush1.bf16.msra.mxu1 %v3675_v61 }
 0x130   : > { %2018 = vmatprep.subr.bf16.mxu0 %v3678_v62  ;;  %2059 = vmatprep.subr.bf16.mxu1 %v3736_v47 }
 0x133   : > { %2019 = vmatpush1.bf16.msra.mxu0 %v3676_v63  ;;  %2060 = vmatpush1.bf16.msra.mxu1 %v3679_v0 }
 0x134   : > { %2020 = vmatprep.subr.bf16.mxu0 %v3682_v1  ;;  %2061 = vmatprep.subr.bf16.mxu1 %v3736_v47 }
 0x137   : > { %2021 = vmatpush1.bf16.msra.mxu0 %v3680_v2  ;;  %2062 = vmatpush1.bf16.msra.mxu1 %v3683_v3 }
 0x138   : > { %2022 = vmatprep.subr.bf16.mxu0 %v3686_v4  ;;  %2063 = vmatprep.subr.bf16.mxu1 %v3736_v47 }
 0x13b   : > { %2023 = vmatpush1.bf16.msra.mxu0 %v3684_v5  ;;  %2064 = vmatpush1.bf16.msra.mxu1 %v3687_v7 }
 0x13c   : > { %3420 = vmatprep.subr.bf16.mxu1 %v4715_v8  ;;  %3328 = vmatprep.subr.bf16.mxu0 %v4420_v16 }
 0x13e   : > { %2029 = vmatmul.mubr.bf16.vlgmr.msra.gmra.mrb[16].mxu0 %v4268_v46  ;;  %2070 = vmatmul.mubr.bf16.vlgmr.msra.gmra.mrb[12].mxu1 %v4268_v46 }
 0x13f   : > { %3421 = vmatpush3.bf16.msra.mxu1 %v4417_v15  ;;  %3329 = vmatpush3.bf16.msra.mxu0 %v4424_v17 }
 0x140   : > { %3422 = vmatprep.subr.bf16.mxu1 %v4715_v8  ;;  %3330 = vmatprep.subr.bf16.mxu0 %v4437_v21 }
 0x141   : > { %3436 = vmatprep.mubr.msk.f32.mxu1 %vm3739_vm3, %v4715_v8 }
 0x143   : > { %3423 = vmatpush3.bf16.msra.mxu1 %v4431_v19  ;;  %3331 = vmatpush3.bf16.msra.mxu0 %v4440_v22 }
 0x144   : > { %3424 = vmatprep.subr.bf16.mxu1 %v4715_v8  ;;  %3332 = vmatprep.subr.bf16.mxu0 %v4449_v26 }
 0x147   : > { %3425 = vmatpush3.bf16.msra.mxu1 %v4445_v25  ;;  %3333 = vmatpush3.bf16.msra.mxu0 %v4453_v27 }
 0x148   : > { %3426 = vmatprep.subr.bf16.mxu1 %v4715_v8  ;;  %3334 = vmatprep.subr.bf16.mxu0 %v4461_v29 }
 0x14b   : > { %3427 = vmatpush3.bf16.msra.mxu1 %v4457_v28  ;;  %3335 = vmatpush3.bf16.msra.mxu0 %v4465_v30 }
 0x14c   : > { %3428 = vmatprep.subr.bf16.mxu1 %v4715_v8  ;;  %3336 = vmatprep.subr.bf16.mxu0 %v4473_v32 }
 0x14f   : > { %3429 = vmatpush3.bf16.msra.mxu1 %v4469_v31  ;;  %3337 = vmatpush3.bf16.msra.mxu0 %v4477_v33 }
 0x150   : > { %3430 = vmatprep.subr.bf16.mxu1 %v4715_v8  ;;  %3338 = vmatprep.subr.bf16.mxu0 %v4493_v35 }
 0x153   : > { %3431 = vmatpush3.bf16.msra.mxu1 %v4489_v34  ;;  %3339 = vmatpush3.bf16.msra.mxu0 %v4497_v36 }
 0x154   : > { %3432 = vmatprep.subr.bf16.mxu1 %v4715_v8  ;;  %3340 = vmatprep.subr.bf16.mxu0 %v4511_v38 }
 0x157   : > { %3433 = vmatpush3.bf16.msra.mxu1 %v4508_v37  ;;  %3341 = vmatpush3.bf16.msra.mxu0 %v4521_v40 }
 0x158   : > { %3434 = vmatprep.subr.bf16.mxu1 %v4715_v8  ;;  %3342 = vmatprep.subr.bf16.mxu0 %v4534_v44 }
 0x15b   : > { %3435 = vmatpush3.bf16.msra.mxu1 %v4531_v43  ;;  %3343 = vmatpush3.bf16.msra.mxu0 %v4537_v45 }
 0x15c   : > { %3439 = vmatprep.subr.bf16.mxu1 %v4715_v8  ;;  %3356 = vmatprep.subr.bf16.mxu0 %v4420_v16 }
 0x169   : > { %v4397_v9 = vpop.f32.mrb[0].mxu0  ;;  %v4399_v10 = vpop.f32.mrb[0].mxu1 }
 0x16a   : > { %v4401_v11 = vpop.f32.mrb[1].mxu0  ;;  %v4403_v12 = vpop.f32.mrb[1].mxu1 }
 0x16b   : > { %v4405_v47 = vpop.f32.mrb[2].mxu0  ;;  %v3419_v13 = vpop.f32.mrb[2].mxu1 }
 0x16c   : > { %v4407_v14 = vpop.f32.mrb[3].mxu0  ;;  %v4409_v46 = vpop.f32.mrb[3].mxu1  ;;  %v3192_v13 = vld [vmem:[%s4504_s30 + $0x1] ss:$4 sm:$0x7] }
 0x16d   : > { %v1704_v41 = vrot.slane %v3192_v13, %v4525_v42 }
 0x171   : > { %v4426_v18 = vpop.f32.mrb[4].mxu0 }
 0x172   : > { %v4433_v20 = vpop.f32.mrb[5].mxu0 }
 0x173   : > { %v872_v23 = vpop.f32.mrb[6].mxu0 }
 0x174   : > { %v873_v24 = vpop.f32.mrb[7].mxu0  ;;  %v1700_v23 = vrot.slane %v3192_v13, %v4514_v6 }
 0x175   : > { %v1708_v24 = vrot.slane %v3192_v13, %v4517_v39 }
 0x1a1   : > { %v1265_v50 = vpop.f32.mrb[8].mxu0  ;;  %v1306_v51 = vpop.f32.mrb[4].mxu1 }
 0x1a2   : > { %v1329_v52 = vadd.f32 %v1317_v48, %v1265_v50  ;;  %v1331_v53 = vadd.f32 %v1325_v49, %v1306_v51  ;;  %v1267_v54 = vpop.f32.mrb[9].mxu0  ;;  %v1308_v55 = vpop.f32.mrb[5].mxu1 }
 0x1a3   : > { %v1330_v56 = vadd.f32 %v1321_v57, %v1267_v54  ;;  %v1269_v58 = vpop.f32.mrb[10].mxu0  ;;  %v1309_v59 = vpop.f32.mrb[6].mxu1 }
 0x1a4   : > { %v2146_v60 = vmul.f32 %v1329_v52, %v4397_v9  ;;  %v2434_v61 = vmul.f32 %v1329_v52, %v4405_v47  ;;  %v2569_v62 = vmul.f32 %v1329_v52, %v4426_v18  ;;  %v2148_v63 = vmul.f32 %v1331_v53, %v4403_v12  ;;  %v1270_v0 = vpop.f32.mrb[11].mxu0  ;;  %v1310_v1 = vpop.f32.mrb[7].mxu1 }
 0x1a5   : > { %v2436_v2 = vmul.f32 %v1331_v53, %v4409_v46  ;;  %v2571_v3 = vmul.f32 %v4399_v10, %v1331_v53  ;;  %v2147_v4 = vmul.f32 %v1330_v56, %v4401_v11  ;;  %v2435_v5 = vmul.f32 %v1330_v56, %v4407_v14 }
 0x1a6   : > { %v2570_v7 = vmul.f32 %v1330_v56, %v4433_v20 }
 0x1d9   : > { %v1647_v48 = vpop.f32.mrb[12].mxu0  ;;  %v1688_v49 = vpop.f32.mrb[8].mxu1 }
 0x1da   : > { %v1712_v57 = vadd.f32 %v1700_v23, %v1647_v48  ;;  %v1714_v50 = vadd.f32 %v1708_v24, %v1688_v49  ;;  %v1649_v51 = vpop.f32.mrb[13].mxu0  ;;  %v1690_v52 = vpop.f32.mrb[9].mxu1 }
 0x1db   : > { %v1713_v53 = vadd.f32 %v1704_v41, %v1649_v51  ;;  %v1651_v54 = vpop.f32.mrb[14].mxu0  ;;  %v1691_v55 = vpop.f32.mrb[10].mxu1 }
 0x1dc   : > { %v2152_v58 = vrot.slane %v1712_v57, 6  ;;  %v2154_v59 = vrot.slane %v1714_v50, 6  ;;  %v1652_v0 = vpop.f32.mrb[15].mxu0  ;;  %v1692_v56 = vpop.f32.mrb[11].mxu1 }
 0x1dd   : > { %v2153_v1 = vrot.slane %v1713_v53, 6 }
 0x1de   : > { %v2158_v8 = vmul.f32 %v2152_v58, %v4397_v9  ;;  %v2437_v16 = vmul.f32 %v2152_v58, %v4405_v47  ;;  %v2572_v13 = vmul.f32 %v2152_v58, %v4426_v18  ;;  %v2160_v45 = vmul.f32 %v2154_v59, %v4403_v12 }
 0x1df   : > { %v2439_v23 = vmul.f32 %v2154_v59, %v4409_v46  ;;  %v2574_v24 = vmul.f32 %v4399_v10, %v2154_v59  ;;  %v2159_v41 = vmul.f32 %v2153_v1, %v4401_v11  ;;  %v2438_v48 = vmul.f32 %v2153_v1, %v4407_v14 }
 0x1e0   : > { %v2164_v49 = vrot.slane %v2158_v8, 2  ;;  %v2443_v57 = vrot.slane %v2437_v16, 2  ;;  %v2578_v50 = vrot.slane %v2572_v13, 2  ;;  %v2166_v51 = vrot.slane %v2160_v45, 2 }
 0x1e1   : > { %v2445_v52 = vrot.slane %v2439_v23, 2  ;;  %v2580_v53 = vrot.slane %v2574_v24, 2  ;;  %v2165_v54 = vrot.slane %v2159_v41, 2  ;;  %v2444_v55 = vrot.slane %v2438_v48, 2 }
 0x1e2   : > { %v2170_v58 = vadd.f32 %v2164_v49, %v2146_v60  ;;  %v2449_v0 = vadd.f32 %v2443_v57, %v2434_v61  ;;  %v2584_v56 = vadd.f32 %v2578_v50, %v2569_v62  ;;  %v2172_v43 = vadd.f32 %v2166_v51, %v2148_v63  ;;  %v3293_v16 = vld [vmem:[%s4504_s30 + $0x2] ss:$4 sm:$0x7] }
 0x1e3   : > { %v2451_v44 = vadd.f32 %v2445_v52, %v2436_v2  ;;  %v2586_v40 = vadd.f32 %v2580_v53, %v2571_v3  ;;  %v2573_v59 = vmul.f32 %v2153_v1, %v4433_v20  ;;  %v2171_v37 = vadd.f32 %v2165_v54, %v2147_v4 }
 0x1e4   : > { %v2450_v38 = vadd.f32 %v2444_v55, %v2435_v5  ;;  %v2083_v45 = vrot.slane %v3293_v16, %v4514_v6  ;;  %v2091_v13 = vrot.slane %v3293_v16, %v4517_v39  ;;  %v2087_v23 = vrot.slane %v3293_v16, %v4525_v42 }
 0x1e5   : > { %v2579_v36 = vrot.slane %v2573_v59, 2  ;;  %v2200_v1 = vrot.slane %v4397_v9, 6  ;;  %v2201_v4 = vrot.slane %v4401_v11, 6  ;;  %v2470_v6 = vrot.slane %v4405_v47, 6 }
 0x1e6   : > { %v2202_v39 = vrot.slane %v4403_v12, 6  ;;  %v2471_v57 = vrot.slane %v4407_v14, 6  ;;  %v2472_v50 = vrot.slane %v4409_v46, 6  ;;  %v2605_v51 = vrot.slane %v4426_v18, 6 }
 0x1e7   : > { %v4571_v8 = vadd.f32 %v2579_v36, %v2570_v7  ;;  %v2607_v36 = vrot.slane %v4399_v10, 6 }
 0x211   : > { %v2030_v60 = vpop.f32.mrb[16].mxu0  ;;  %v2071_v61 = vpop.f32.mrb[12].mxu1 }
 0x212   : > { %v2095_v62 = vadd.f32 %v2083_v45, %v2030_v60  ;;  %v2097_v63 = vadd.f32 %v2091_v13, %v2071_v61  ;;  %v2032_v2 = vpop.f32.mrb[17].mxu0  ;;  %v2073_v3 = vpop.f32.mrb[13].mxu1 }
 0x213   : > { %v2096_v5 = vadd.f32 %v2087_v23, %v2032_v2  ;;  %v2034_v7 = vpop.f32.mrb[18].mxu0  ;;  %v2074_v24 = vpop.f32.mrb[14].mxu1 }
 0x214   : > { %v2176_v42 = vrot.slane %v2095_v62, 4  ;;  %v2178_v41 = vrot.slane %v2097_v63, 4  ;;  %v2035_v48 = vpop.f32.mrb[19].mxu0  ;;  %v2075_v49 = vpop.f32.mrb[15].mxu1 }
 0x215   : > { %v2177_v52 = vrot.slane %v2096_v5, 4 }
 0x216   : > { %v2182_v53 = vmul.f32 %v2176_v42, %v4397_v9  ;;  %v2452_v54 = vmul.f32 %v2176_v42, %v4405_v47  ;;  %v2587_v55 = vmul.f32 %v2176_v42, %v4426_v18  ;;  %v2184_v59 = vmul.f32 %v2178_v41, %v4403_v12 }
 0x217   : > { %v2454_v16 = vmul.f32 %v2178_v41, %v4409_v46  ;;  %v2589_v45 = vmul.f32 %v4399_v10, %v2178_v41  ;;  %v2183_v13 = vmul.f32 %v2177_v52, %v4401_v11  ;;  %v2453_v23 = vmul.f32 %v2177_v52, %v4407_v14 }
 0x218   : > { %v2188_v60 = vrot.slane %v2182_v53, 4  ;;  %v2458_v61 = vrot.slane %v2452_v54, 4  ;;  %v2593_v62 = vrot.slane %v2587_v55, 4  ;;  %v2190_v63 = vrot.slane %v2184_v59, 4  ;;  %v4746_v53 = vld [vmem:[#allocation10_spill] sm:$0xff]  ;;  %v4747_v54 = vld [vmem:[#allocation9_spill] sm:$0xff] }
 0x219   : > { %v2460_v9 = vrot.slane %v2454_v16, 4  ;;  %v2595_v2 = vrot.slane %v2589_v45, 4  ;;  %v2189_v47 = vrot.slane %v2183_v13, 4  ;;  %v2459_v3 = vrot.slane %v2453_v23, 4  ;;  %v4748_v55 = vld [vmem:[#allocation11_spill] sm:$0xff]  ;;  %v4749_v59 = vld [vmem:[#allocation4_spill] sm:$0xff] }
 0x21a   : > { %v2194_v18 = vadd.f32 %v2188_v60, %v2170_v58  ;;  %v2464_v5 = vadd.f32 %v2458_v61, %v2449_v0  ;;  %v2599_v12 = vadd.f32 %v2593_v62, %v2584_v56  ;;  %v2196_v7 = vadd.f32 %v2190_v63, %v2172_v43 }
 0x21b   : > { %v2466_v10 = vadd.f32 %v2460_v9, %v2451_v44  ;;  %v2601_v11 = vadd.f32 %v2595_v2, %v2586_v40  ;;  %v2588_v14 = vmul.f32 %v2177_v52, %v4433_v20  ;;  %v2195_v46 = vadd.f32 %v2189_v47, %v2171_v37  ;;  %v4745_v52 = vld [vmem:[#allocation8_spill] sm:$0xff] }
 0x21c   : > { %v2208_v24 = vadd.f32 %v2202_v39, %v2196_v7  ;;  %v2206_v42 = vadd.f32 %v2200_v1, %v2194_v18  ;;  %v2465_v41 = vadd.f32 %v2459_v3, %v2450_v38  ;;  %v4600_v58 = vadd.f32 %v2470_v6, %v2464_v5 }
 0x21d   : > { %v2594_v0 = vrot.slane %v2588_v14, 4  ;;  %v2207_v43 = vadd.f32 %v2201_v4, %v2195_v46  ;;  %v2478_v56 = vadd.f32 %v2472_v50, %v2466_v10  ;;  %v4602_v48 = vadd.f32 %v2607_v36, %v2601_v11  ;;  %v4743_v50 = vld [vmem:[#allocation7_spill] sm:$0xff] }
 0x21e   : > { %2211 = vst [vmem:[%s4597_s26 + $0x10] sm:$0x3] %v2208_v24  ;;  %3437 = vmatmul.mubr.f32.vlgmr.msra.gmra.mrb[16].mxu1 %v2208_v24  ;;  %2209 = vst [vmem:[%s4597_s26] sm:$0x3] %v2206_v42  ;;  %v2477_v44 = vadd.f32 %v2471_v57, %v2465_v41  ;;  %v2482_v40 = vrot.slane %v4600_v58, 6  ;;  %v4607_v37 = vadd.f32 %v2605_v51, %v2599_v12  ;;  %v2606_v1 = vrot.slane %v4433_v20, 6  ;;  %v4742_v57 = vld [vmem:[#allocation5_spill] sm:$0xff] }
 0x21f   : > { %3440 = vmatpush3.bf16.msra.mxu1 %v4417_v15  ;;  %2210 = vst [vmem:[%s4597_s26 + $0x8] sm:$0x3] %v2207_v43  ;;  %2388 = vmatprep.mubr.f32.mxu0 %v2207_v43  ;;  %v2484_v38 = vrot.slane %v2478_v56, 6  ;;  %v2600_v4 = vadd.f32 %v2594_v0, %v4571_v8  ;;  %v2619_v36 = vrot.slane %v4602_v48, 4  ;;  %v4741_v39 = vmov 0.0   ;;  %v4744_v51 = vld [vmem:[#allocation6_spill] sm:$0xff] }
 0x220   : > { %2389 = vmatmul.mubr.f32.vlgmr.msra.gmra.mrb[20].mxu0 %v2206_v42  ;;  %v2483_v6 = vrot.slane %v2477_v44, 6  ;;  %3441 = vmatprep.subr.bf16.mxu1 %v4741_v39  ;;  %2488 = vst [vmem:[%s4597_s26] sm:$0xc] %v2482_v40  ;;  %v2617_v20 = vrot.slane %v4607_v37, 4 }
 0x221   : > { %3357 = vmatpush3.bf16.msra.mxu0 %v4424_v17  ;;  %2523 = vmatprep.mubr.f32.mxu0 %v2477_v44  ;;  %2490 = vst [vmem:[%s4597_s26 + $0x10] sm:$0xc] %v2484_v38  ;;  %v2612_v49 = vadd.f32 %v2606_v1, %v2600_v4  ;;  %2625 = vst [vmem:[%s4597_s26 + $0x10] sm:$0x30] %v2619_v36 }
 0x222   : > { %2489 = vst [vmem:[%s4597_s26 + $0x8] sm:$0xc] %v2483_v6  ;;  %3358 = vmatprep.subr.bf16.mxu0 %v4437_v21  ;;  %3455 = vmatprep.mubr.msk.f32.mxu1 %vm3739_vm3, %v4741_v39  ;;  %2623 = vst [vmem:[%s4597_s26] sm:$0x30] %v2617_v20 }
 0x223   : > { %3442 = vmatpush3.bf16.msra.mxu1 %v4431_v19  ;;  %v2618_v8 = vrot.slane %v2612_v49, 4 }
 0x224   : > { %3443 = vmatprep.subr.bf16.mxu1 %v4741_v39 }
 0x225   : > { %3359 = vmatpush3.bf16.msra.mxu0 %v4440_v22  ;;  %2624 = vst [vmem:[%s4597_s26 + $0x8] sm:$0x30] %v2618_v8 }
 0x226   : > { %3360 = vmatprep.subr.bf16.mxu0 %v4449_v26 }
 0x227   : > { %3444 = vmatpush3.bf16.msra.mxu1 %v4445_v25 }
 0x228   : > { %3445 = vmatprep.subr.bf16.mxu1 %v4741_v39 }
 0x229   : > { %3361 = vmatpush3.bf16.msra.mxu0 %v4453_v27 }
 0x22a   : > { %3362 = vmatprep.subr.bf16.mxu0 %v4461_v29 }
 0x22b   : > { %3446 = vmatpush3.bf16.msra.mxu1 %v4457_v28 }
 0x22c   : > { %3447 = vmatprep.subr.bf16.mxu1 %v4741_v39 }
 0x22d   : > { %3363 = vmatpush3.bf16.msra.mxu0 %v4465_v30 }
 0x22e   : > { %3364 = vmatprep.subr.bf16.mxu0 %v4473_v32 }
 0x22f   : > { %3448 = vmatpush3.bf16.msra.mxu1 %v4469_v31 }
 0x230   : > { %3449 = vmatprep.subr.bf16.mxu1 %v4741_v39 }
 0x231   : > { %3365 = vmatpush3.bf16.msra.mxu0 %v4477_v33 }
 0x232   : > { %3366 = vmatprep.subr.bf16.mxu0 %v4493_v35 }
 0x233   : > { %3450 = vmatpush3.bf16.msra.mxu1 %v4489_v34 }
 0x234   : > { %3451 = vmatprep.subr.bf16.mxu1 %v4741_v39 }
 0x235   : > { %3367 = vmatpush3.bf16.msra.mxu0 %v4742_v57 }
 0x236   : > { %3368 = vmatprep.subr.bf16.mxu0 %v4743_v50 }
 0x237   : > { %3452 = vmatpush3.bf16.msra.mxu1 %v4744_v51 }
 0x238   : > { %3453 = vmatprep.subr.bf16.mxu1 %v4741_v39 }
 0x239   : > { %3369 = vmatpush3.bf16.msra.mxu0 %v4745_v52 }
 0x23a   : > { %3370 = vmatprep.subr.bf16.mxu0 %v4746_v53 }
 0x23b   : > { %3454 = vmatpush3.bf16.msra.mxu1 %v4747_v54 }
 0x23c   : > { %3458 = vmatprep.subr.bf16.mxu1 %v4741_v39 }
 0x23d   : > { %3371 = vmatpush3.bf16.msra.mxu0 %v4748_v55 }
 0x23e   : > { %3456 = vmatmul.mubr.f32.vlgmr.msra.gmra.mrb[18].mxu1 %v2478_v56  ;;  %3384 = vmatprep.subr.bf16.mxu0 %v4749_v59 }
 0x23f   : > { %3459 = vmatpush3.bf16.msra.mxu1 %v4417_v15  ;;  %3474 = vmatprep.mubr.msk.f32.mxu1 %vm3739_vm3, %v4741_v39 }
 0x240   : > { %2524 = vmatmul.mubr.f32.vlgmr.msra.gmra.mrb[22].mxu0 %v4600_v58  ;;  %3460 = vmatprep.subr.bf16.mxu1 %v4741_v39 }
 0x241   : > { %3385 = vmatpush3.bf16.msra.mxu0 %v4424_v17  ;;  %2658 = vmatprep.mubr.f32.mxu0 %v2612_v49 }
 0x242   : > { %3386 = vmatprep.subr.bf16.mxu0 %v4437_v21 }
 0x243   : > { %3461 = vmatpush3.bf16.msra.mxu1 %v4431_v19 }
 0x244   : > { %3462 = vmatprep.subr.bf16.mxu1 %v4741_v39 }
 0x245   : > { %3387 = vmatpush3.bf16.msra.mxu0 %v4440_v22 }
 0x246   : > { %3388 = vmatprep.subr.bf16.mxu0 %v4449_v26 }
 0x247   : > { %3463 = vmatpush3.bf16.msra.mxu1 %v4445_v25 }
 0x248   : > { %3464 = vmatprep.subr.bf16.mxu1 %v4741_v39 }
 0x249   : > { %3389 = vmatpush3.bf16.msra.mxu0 %v4453_v27 }
 0x24a   : > { %3390 = vmatprep.subr.bf16.mxu0 %v4461_v29 }
 0x24b   : > { %3465 = vmatpush3.bf16.msra.mxu1 %v4457_v28 }
 0x24c   : > { %3466 = vmatprep.subr.bf16.mxu1 %v4741_v39 }
 0x24d   : > { %3391 = vmatpush3.bf16.msra.mxu0 %v4465_v30 }
 0x24e   : > { %3392 = vmatprep.subr.bf16.mxu0 %v4473_v32 }
 0x24f   : > { %3467 = vmatpush3.bf16.msra.mxu1 %v4469_v31 }
 0x250   : > { %3468 = vmatprep.subr.bf16.mxu1 %v4741_v39 }
 0x251   : > { %3393 = vmatpush3.bf16.msra.mxu0 %v4477_v33 }
 0x252   : > { %3394 = vmatprep.subr.bf16.mxu0 %v4493_v35 }
 0x253   : > { %3469 = vmatpush3.bf16.msra.mxu1 %v4489_v34 }
 0x254   : > { %3470 = vmatprep.subr.bf16.mxu1 %v4741_v39 }
 0x255   : > { %3395 = vmatpush3.bf16.msra.mxu0 %v4742_v57 }
 0x256   : > { %3396 = vmatprep.subr.bf16.mxu0 %v4743_v50 }
 0x257   : > { %3471 = vmatpush3.bf16.msra.mxu1 %v4744_v51 }
 0x258   : > { %3472 = vmatprep.subr.bf16.mxu1 %v4741_v39 }
 0x259   : > { %3397 = vmatpush3.bf16.msra.mxu0 %v4745_v52 }
 0x25a   : > { %3398 = vmatprep.subr.bf16.mxu0 %v4746_v53 }
 0x25b   : > { %3473 = vmatpush3.bf16.msra.mxu1 %v4747_v54 }
 0x25d   : > { %3399 = vmatpush3.bf16.msra.mxu0 %v4748_v55 }
 0x25e   : > { %3475 = vmatmul.mubr.f32.vlgmr.msra.gmra.mrb[20].mxu1 %v4602_v48 }
 0x260   : > { %2659 = vmatmul.mubr.f32.vlgmr.msra.gmra.mrb[24].mxu0 %v4607_v37 }
 0x2f1   : > { %v2428_v15 = vpop.f32.mrb[16].mxu1 }
 0x2f2   : > { %v3438_v17 = vpop.f32.mrb[17].mxu1 }
 0x2f3   : > { %v3344_v19 = vpop.f32.mrb[20].mxu0 }
 0x2f4   : > { %v3345_v21 = vpop.f32.mrb[21].mxu0 }
 0x2f5   : > { %v3346_v22 = vadd.f32 %v3345_v21, %v3344_v19 }
 0x2f7   : > { %v2429_v25 = vadd.f32 %v3346_v22, %v2428_v15 }
 0x2f9   : > { %2433 = vst.msk [vmem:[%s760_s14] sm:$0x3] %vm2432_vm4, %v2429_v25 }
 0x311   : > { %v2563_v26 = vpop.f32.mrb[18].mxu1 }
 0x312   : > { %v3457_v27 = vpop.f32.mrb[19].mxu1 }
 0x313   : > { %v3372_v28 = vpop.f32.mrb[22].mxu0 }
 0x314   : > { %v3373_v29 = vpop.f32.mrb[23].mxu0 }
 0x315   : > { %v3374_v30 = vadd.f32 %v3373_v29, %v3372_v28 }
 0x317   : > { %v2564_v31 = vadd.f32 %v3374_v30, %v2563_v26 }
 0x319   : > { %3318 = vst.msk [vmem:[%s760_s14 + $0x2] sm:$0x3] %vm2432_vm4, %v2564_v31 }
 0x331   : > { %v2698_v32 = vpop.f32.mrb[20].mxu1 }
 0x332   : > { %v3476_v33 = vpop.f32.mrb[21].mxu1 }
 0x333   : > { %v3400_v34 = vpop.f32.mrb[24].mxu0 }
 0x334   : > { %v3401_v35 = vpop.f32.mrb[25].mxu0 }
 0x335   : > { %v3402_v16 = vadd.f32 %v3401_v35, %v3400_v34 }
 0x337   : > { %v2699_v45 = vadd.f32 %v3402_v16, %v2698_v32 }
 0x339   : > { %3319 = vst.msk [vmem:[%s760_s14 + $0x4] sm:$0x3] %vm2432_vm4, %v2699_v45 }
 0x33a PF: > { %p15_p11 = scmp.ge.s32.totalorder %s3799_s28, 4   ;;  %s4750_s24 = smov %s3730_s25 }
 0x33b   : > { %s4751_s25 = smov %s3808_s8  ;;  %s4752_s26 = smov %s3799_s28 }
 0x33c   :  { %17 = sbr.rel (!%p15_p11) target bundleno = 2 (0x2), region = 175 }

</bundles_post_ra>
